<compile_context>
chip_gen: v6e
topology: v6e:2x2x1
jax: 0.10.0
libtpu: 0.0.40
codegen_flags: <defaults>
</compile_context>

<pallas_src>
import functools

import jax
import jax.numpy as jnp
from jax import lax
from jax.experimental import pallas as pl
from jax.experimental.pallas import tpu as pltpu


# ----------------------------------------------------------------------------
# Pallas kernels
# ----------------------------------------------------------------------------
def _pconv_kernel(p3_ref, msum_ref, w3_ref, b_ref, out_ref, *stat_refs,
                  slide_winsize, bn, leaky_relu):
    """Partial-conv row tile.

    p3_ref : (1, TH, Wp, ks*Cin) bf16 -- input*mask with the vertical taps
             folded into channels (so no H halo is needed).
    The kw horizontal taps are applied as kw shifted MXU matmuls.
    With bn=True, writes the bf16 pre-BN tile + per-tile channel sum / sumsq.
    With bn=False, fuses the activation and writes the final f32 tile.
    """
    _, th, w_sp, cout = out_ref.shape
    ks = w3_ref.shape[0]
    cin3 = p3_ref.shape[3]
    rows = th * w_sp

    p3 = p3_ref[0]                                       # (TH, Wp, ks*Cin) bf16
    acc = jnp.zeros((rows, cout), jnp.float32)
    for dx in range(ks):                                 # horizontal taps
        lhs = p3[:, dx:dx + w_sp, :].reshape(rows, cin3)
        acc = acc + jnp.dot(lhs, w3_ref[dx],
                            preferred_element_type=jnp.float32)

    msum = msum_ref[0].reshape(rows, 1)                  # (rows, 1) f32
    # Exact divide (not approx reciprocal): this feeds the BN batch statistics.
    ratio = slide_winsize / (msum + 1e-8)
    update = jnp.clip(msum, 0.0, 1.0)
    # PartialConv2d: ((raw + b) - b) * (ratio*update) + b, then * update.
    out = (acc * (ratio * update) + b_ref[...]) * update

    if bn:
        stat_refs[0][...] = jnp.sum(out, axis=0, keepdims=True)[None, None]
        stat_refs[1][...] = jnp.sum(out * out, axis=0, keepdims=True)[None, None]
    else:
        if leaky_relu:
            out = jnp.where(out >= 0.0, out, 0.2 * out)
        else:
            out = jnp.maximum(out, 0.0)

    out_ref[0] = out.reshape(th, w_sp, cout).astype(out_ref.dtype)


def _bn_act_kernel(x_ref, scale_ref, shift_ref, o_ref, *, leaky_relu):
    """Per-tile affine BatchNorm + activation (pass 2)."""
    y = x_ref[...].astype(jnp.float32) * scale_ref[...] + shift_ref[...]
    if leaky_relu:
        o_ref[...] = jnp.where(y >= 0.0, y, 0.2 * y)
    else:
        o_ref[...] = jnp.maximum(y, 0.0)


# ----------------------------------------------------------------------------
# Host-side helpers
# ----------------------------------------------------------------------------
def _round_up(x, m):
    return ((x + m - 1) // m) * m


def _vmem_config():
    """Chip-aware (budget, vmem_limit) in bytes.  Falls back to v7x (64 MiB)."""
    cap = 64 * 1024 * 1024
    try:
        cap = int(getattr(pltpu.get_tpu_info(), "vmem_capacity_bytes", cap))
    except Exception:
        pass
    budget = int(cap * 0.55)                       # double-buffered working set
    limit = min(cap - (6 << 20), int(cap * 0.85))  # leave headroom under physical
    return budget, limit


def _pick_th(n, h, wp, wd, cin3, cout, ks, bn, budget_bytes):
    """Largest row-tile height TH whose double-buffered working set fits VMEM.

    Accounting notes (perf review): the (TH, W, 1) mask-sum tile lane-pads to
    128 in VMEM; weight / bias / stats blocks are included; all BlockSpec
    operands are double-buffered.
    """
    cin3_l = _round_up(max(cin3, 128), 128)
    cout_l = _round_up(max(cout, 128), 128)

    def working_set(th):
        p3_blk = th * _round_up(wp, 16) * cin3_l * 2              # bf16 slab
        msum_blk = th * _round_up(wd, 8) * 128 * 4                # (...,1) -> 128 lanes
        out_blk = th * _round_up(wd, 16 if bn else 8) * cout_l * (2 if bn else 4)
        w3_blk = ks * _round_up(cin3, 16) * cout_l * 2
        misc = (8 * 128 * 4) * (5 if bn else 1)                   # bias (+ stats)
        return 2 * (p3_blk + msum_blk + out_blk + w3_blk + misc)

    th = min(h, 256)
    while th > 1 and working_set(th) > budget_bytes:
        th = (th + 1) // 2
    if n == 1 and th >= h and h > 1:   # keep >= 2 grid steps for megacore
        th = (h + 1) // 2
    return max(th, 1)


def _upsample_nearest_2x_nchw(x):
    x = jnp.repeat(x, 2, axis=2)
    x = jnp.repeat(x, 2, axis=3)
    return x


# ----------------------------------------------------------------------------
# Forward pass
# ----------------------------------------------------------------------------
def decoder_layer(x, mask, e_x, e_mask, params, *, kernel_size=3, bn=True,
                  leaky_relu=False):
    """Forward pass of DecoderLayer.  All I/O is NCHW float32."""
    assert kernel_size % 2 == 1, "only odd kernel sizes ('same' padding) supported"
    w, b, gamma, beta = params                   # w: (Cout, Cin, kH, kW)
    ks = kernel_size
    pad = ks // 2

    # Upsample (nearest, 2x) + channel concat -- cheap XLA glue.
    x_u = _upsample_nearest_2x_nchw(x)
    m_u = _upsample_nearest_2x_nchw(mask)
    x_c = jnp.concatenate([x_u, e_x], axis=1)
    m_c = jnp.concatenate([m_u, e_mask], axis=1)

    n, cin, h, wd = x_c.shape
    cout = w.shape[0]
    wp = wd + 2 * pad
    cin3 = ks * cin
    slide_winsize = float(cin * ks * ks)

    x_nhwc = jnp.transpose(x_c, (0, 2, 3, 1)).astype(jnp.float32)
    m_nhwc = jnp.transpose(m_c, (0, 2, 3, 1)).astype(jnp.float32)

    # Mask window sums: zero-padded ks x ks box sum of the channel-summed mask
    # (channel-invariant, so the kernel never sees a (M, Cout) mask).
    m_csum = jnp.sum(m_nhwc, axis=-1)                              # (N,H,W)
    msum = lax.reduce_window(m_csum, 0.0, lax.add,
                             (1, ks, ks), (1, 1, 1), 'SAME')       # (N,H,W)
    update_mask_pix = jnp.clip(msum, 0.0, 1.0)

    # Fold the vertical taps into channels (ks-fold, not ks*ks im2col); the
    # horizontal taps are handled in-kernel.
    prod = x_nhwc * m_nhwc
    prod_pad = jnp.pad(prod, ((0, 0), (pad, pad), (pad, pad), (0, 0)))
    p3 = jnp.concatenate([prod_pad[:, dy:dy + h, :, :] for dy in range(ks)],
                         axis=-1).astype(jnp.bfloat16)             # (N,H,Wp,ks*Cin)

    # Tile sizing: chip-aware VMEM budget with corrected accounting.
    budget, vmem_limit = _vmem_config()
    th = _pick_th(n, h, wp, wd, cin3, cout, ks, bn, budget)
    hpad = _round_up(h, th)
    nt = hpad // th
    if hpad != h:   # padded rows have mask-sum 0 -> output exactly 0 -> BN-safe
        p3 = jnp.pad(p3, ((0, 0), (0, hpad - h), (0, 0), (0, 0)))
    msum4 = msum.reshape(n, h, wd, 1)
    if hpad != h:
        msum4 = jnp.pad(msum4, ((0, 0), (0, hpad - h), (0, 0), (0, 0)))

    # Weights: (Cout, Cin, kH, kW) -> (kW, kH*Cin, Cout), matching p3's channel
    # order (dy*Cin + ci); bf16 for the MXU (f32 accumulation in-kernel).
    w3 = jnp.transpose(w, (3, 2, 1, 0)).reshape(ks, cin3, cout).astype(jnp.bfloat16)
    b_row = b.reshape(1, cout).astype(jnp.float32)

    grid = (n, nt)
    cparams = pltpu.CompilerParams(
        dimension_semantics=("parallel", "parallel"),
        vmem_limit_bytes=int(vmem_limit))

    tile4 = lambda i, j: (i, j, 0, 0)
    in_specs = [
        pl.BlockSpec((1, th, wp, cin3), tile4),                    # folded input slab
        pl.BlockSpec((1, th, wd, 1), tile4),                       # mask window sums
        pl.BlockSpec((ks, cin3, cout), lambda i, j: (0, 0, 0)),    # weights
        pl.BlockSpec((1, cout), lambda i, j: (0, 0)),              # bias
    ]
    kernel1 = functools.partial(_pconv_kernel, slide_winsize=slide_winsize,
                                bn=bn, leaky_relu=leaky_relu)

    if bn:
        out_shape = (
            jax.ShapeDtypeStruct((n, hpad, wd, cout), jnp.bfloat16),   # pre-BN
            jax.ShapeDtypeStruct((n, nt, 1, cout), jnp.float32),       # tile sums
            jax.ShapeDtypeStruct((n, nt, 1, cout), jnp.float32),       # tile sumsq
        )
        out_specs = (
            pl.BlockSpec((1, th, wd, cout), tile4),
            pl.BlockSpec((1, 1, 1, cout), tile4),
            pl.BlockSpec((1, 1, 1, cout), tile4),
        )
    else:
        out_shape = jax.ShapeDtypeStruct((n, hpad, wd, cout), jnp.float32)
        out_specs = pl.BlockSpec((1, th, wd, cout), tile4)

    res = pl.pallas_call(
        kernel1, out_shape=out_shape, grid=grid,
        in_specs=in_specs, out_specs=out_specs,
        compiler_params=cparams,
    )(p3, msum4, w3, b_row)

    if bn:
        conv_bf16, sums, sqs = res
        cnt = float(n * h * wd)                       # padded rows contribute 0
        total = jnp.sum(sums, axis=(0, 1, 2))
        total_sq = jnp.sum(sqs, axis=(0, 1, 2))
        mean = total / cnt
        # TODO(synk): E[x^2]-E[x]^2 in f32 can cancel when |mean| >> std; a
        # shifted accumulation would be more robust if that regime matters.
        var = jnp.maximum(total_sq / cnt - mean * mean, 0.0)   # biased (train)
        inv_std = lax.rsqrt(var + 1e-5)
        g32 = gamma.astype(jnp.float32)
        scale = (g32 * inv_std).reshape(1, 1, 1, cout)
        shift = (beta.astype(jnp.float32) - mean * g32 * inv_std).reshape(1, 1, 1, cout)

        y_nhwc = pl.pallas_call(
            functools.partial(_bn_act_kernel, leaky_relu=leaky_relu),
            out_shape=jax.ShapeDtypeStruct((n, hpad, wd, cout), jnp.float32),
            grid=grid,
            in_specs=[
                pl.BlockSpec((1, th, wd, cout), tile4),
                pl.BlockSpec((1, 1, 1, cout), lambda i, j: (0, 0, 0, 0)),
                pl.BlockSpec((1, 1, 1, cout), lambda i, j: (0, 0, 0, 0)),
            ],
            out_specs=pl.BlockSpec((1, th, wd, cout), tile4),
            compiler_params=cparams,
        )(conv_bf16, scale, shift)
    else:
        y_nhwc = res

    # Epilogue on the small, unpadded NHWC result.
    # TODO(synk): NHWC consumers could skip this transpose entirely.
    x_out = jnp.transpose(y_nhwc[:, :h], (0, 3, 1, 2))
    # PartialConv2d (multi_channel) update mask is channel-invariant: broadcast
    # in the wrapper instead of storing a redundant per-channel copy.
    m_out = jnp.broadcast_to(update_mask_pix[:, None, :, :], (n, cout, h, wd))
    return x_out, m_out


if __name__ == "__main__":
    key = jax.random.PRNGKey(0)
    k1, k2, k3, k4, k5, k6 = jax.random.split(key, 6)

    # Small shapes: decoder input (pre-upsample) is 8x8, encoder skip is 16x16.
    N, C_DEC, C_ENC, H, W = 2, 4, 4, 8, 8
    CIN = C_DEC + C_ENC          # in_filters of the PartialConv2d (post concat)
    COUT = 8                     # out_filters
    KS = 3

    x = jax.random.normal(k1, (N, C_DEC, H, W), jnp.float32)
    mask = (jax.random.uniform(k2, (N, C_DEC, H, W)) > 0.3).astype(jnp.float32)
    e_x = jax.random.normal(k3, (N, C_ENC, 2 * H, 2 * W), jnp.float32)
    e_mask = (jax.random.uniform(k4, (N, C_ENC, 2 * H, 2 * W)) > 0.3).astype(jnp.float32)

    # Deterministic parameter init (conv weight/bias random; BN affine at
    # PyTorch defaults gamma=1, beta=0).
    w = jax.random.normal(k5, (COUT, CIN, KS, KS), jnp.float32) * 0.1
    b = jax.random.normal(k6, (COUT,), jnp.float32) * 0.1
    gamma = jnp.ones((COUT,), jnp.float32)
    beta = jnp.zeros((COUT,), jnp.float32)

    out_x, out_mask = decoder_layer(x, mask, e_x, e_mask, (w, b, gamma, beta),
                                    kernel_size=KS, bn=True, leaky_relu=False)
    jax.block_until_ready((out_x, out_mask))

    assert out_x.shape == (N, COUT, 2 * H, 2 * W), out_x.shape
    assert out_mask.shape == (N, COUT, 2 * H, 2 * W), out_mask.shape
    assert bool(jnp.all(jnp.isfinite(out_x)))
    assert bool(jnp.all(out_x >= 0.0))                      # ReLU applied
    assert bool(jnp.all((out_mask >= 0.0) & (out_mask <= 1.0)))
    print("KERNEL_OK")
</pallas_src>

<mosaic_0001>
module attributes {stable_mosaic.version = 11 : i64} {
  func.func @_pconv_kernel(%arg0: i32, %arg1: i32, %arg2: memref<1x16x18x24xbf16, #tpu.memory_space<vmem>>, %arg3: memref<1x16x16x1xf32, #tpu.memory_space<vmem>>, %arg4: memref<3x24x8xbf16, #tpu.memory_space<vmem>>, %arg5: memref<1x8xf32, #tpu.memory_space<vmem>>, %arg6: memref<1x16x16x8xbf16, #tpu.memory_space<vmem>>, %arg7: memref<1x1x1x8xf32, #tpu.memory_space<vmem>>, %arg8: memref<1x1x1x8xf32, #tpu.memory_space<vmem>>) attributes {dimension_semantics = [#tpu.dimension_semantics<parallel>, #tpu.dimension_semantics<parallel>], iteration_bounds = array<i64: 2, 1>, scalar_prefetch = 0 : i64, scratch_operands = 0 : i64, tpu.core_type = #tpu.core_type<tc>, window_params = [{transform_indices = @transform_0, window_bounds = array<i64: 1, 16, 18, 24>}, {transform_indices = @transform_1, window_bounds = array<i64: 1, 16, 16, 1>}, {pipeline_mode = #tpu.pipeline_mode<synchronous>, transform_indices = @transform_2, window_bounds = array<i64: 3, 24, 8>}, {pipeline_mode = #tpu.pipeline_mode<synchronous>, transform_indices = @transform_3, window_bounds = array<i64: 1, 8>}, {transform_indices = @transform_4, window_bounds = array<i64: 1, 16, 16, 8>}, {transform_indices = @transform_5, window_bounds = array<i64: 1, 1, 1, 8>}, {transform_indices = @transform_6, window_bounds = array<i64: 1, 1, 1, 8>}]} {
    %c0 = arith.constant 0 : index
    %c0_0 = arith.constant 0 : index
    %c0_1 = arith.constant 0 : index
    %c0_2 = arith.constant 0 : index
    %0 = vector.load %arg2[%c0, %c0_0, %c0_1, %c0_2] : memref<1x16x18x24xbf16, #tpu.memory_space<vmem>>, vector<1x16x18x24xbf16>
    %1 = vector.shape_cast %0 : vector<1x16x18x24xbf16> to vector<16x18x24xbf16>
    %cst = arith.constant 0.000000e+00 : f32
    %2 = vector.broadcast %cst : f32 to vector<256x8xf32>
    %3 = vector.extract_strided_slice %1 {offsets = [0, 0, 0], sizes = [16, 16, 24], strides = [1, 1, 1]} : vector<16x18x24xbf16> to vector<16x16x24xbf16>
    %4 = vector.shape_cast %3 : vector<16x16x24xbf16> to vector<256x24xbf16>
    %c0_3 = arith.constant 0 : index
    %c0_4 = arith.constant 0 : index
    %c0_5 = arith.constant 0 : index
    %5 = vector.load %arg4[%c0_3, %c0_4, %c0_5] : memref<3x24x8xbf16, #tpu.memory_space<vmem>>, vector<1x24x8xbf16>
    %6 = vector.shape_cast %5 : vector<1x24x8xbf16> to vector<24x8xbf16>
    %cst_6 = arith.constant dense<0.000000e+00> : vector<256x8xf32>
    %7 = tpu.matmul %4, %6, %cst_6 {dimension_numbers = #tpu.dot_dimension_numbers<[1], [0], [0], [1], [0, 0, 1, 1], [], []>} : vector<256x24xbf16>, vector<24x8xbf16>, vector<256x8xf32> -> vector<256x8xf32>
    %8 = arith.addf %2, %7 : vector<256x8xf32>
    %9 = vector.extract_strided_slice %1 {offsets = [0, 1, 0], sizes = [16, 16, 24], strides = [1, 1, 1]} : vector<16x18x24xbf16> to vector<16x16x24xbf16>
    %10 = vector.shape_cast %9 : vector<16x16x24xbf16> to vector<256x24xbf16>
    %c1 = arith.constant 1 : index
    %c0_7 = arith.constant 0 : index
    %c0_8 = arith.constant 0 : index
    %11 = vector.load %arg4[%c1, %c0_7, %c0_8] : memref<3x24x8xbf16, #tpu.memory_space<vmem>>, vector<1x24x8xbf16>
    %12 = vector.shape_cast %11 : vector<1x24x8xbf16> to vector<24x8xbf16>
    %cst_9 = arith.constant dense<0.000000e+00> : vector<256x8xf32>
    %13 = tpu.matmul %10, %12, %cst_9 {dimension_numbers = #tpu.dot_dimension_numbers<[1], [0], [0], [1], [0, 0, 1, 1], [], []>} : vector<256x24xbf16>, vector<24x8xbf16>, vector<256x8xf32> -> vector<256x8xf32>
    %14 = arith.addf %8, %13 : vector<256x8xf32>
    %15 = vector.extract_strided_slice %1 {offsets = [0, 2, 0], sizes = [16, 16, 24], strides = [1, 1, 1]} : vector<16x18x24xbf16> to vector<16x16x24xbf16>
    %16 = vector.shape_cast %15 : vector<16x16x24xbf16> to vector<256x24xbf16>
    %c2 = arith.constant 2 : index
    %c0_10 = arith.constant 0 : index
    %c0_11 = arith.constant 0 : index
    %17 = vector.load %arg4[%c2, %c0_10, %c0_11] : memref<3x24x8xbf16, #tpu.memory_space<vmem>>, vector<1x24x8xbf16>
    %18 = vector.shape_cast %17 : vector<1x24x8xbf16> to vector<24x8xbf16>
    %cst_12 = arith.constant dense<0.000000e+00> : vector<256x8xf32>
    %19 = tpu.matmul %16, %18, %cst_12 {dimension_numbers = #tpu.dot_dimension_numbers<[1], [0], [0], [1], [0, 0, 1, 1], [], []>} : vector<256x24xbf16>, vector<24x8xbf16>, vector<256x8xf32> -> vector<256x8xf32>
    %20 = arith.addf %14, %19 : vector<256x8xf32>
    %c0_13 = arith.constant 0 : index
    %c0_14 = arith.constant 0 : index
    %c0_15 = arith.constant 0 : index
    %c0_16 = arith.constant 0 : index
    %21 = vector.load %arg3[%c0_13, %c0_14, %c0_15, %c0_16] : memref<1x16x16x1xf32, #tpu.memory_space<vmem>>, vector<1x16x16x1xf32>
    %22 = vector.shape_cast %21 : vector<1x16x16x1xf32> to vector<16x16x1xf32>
    %23 = vector.shape_cast %22 : vector<16x16x1xf32> to vector<256x1xf32>
    %cst_17 = arith.constant 9.99999993E-9 : f32
    %24 = vector.broadcast %cst_17 : f32 to vector<256x1xf32>
    %25 = arith.addf %23, %24 : vector<256x1xf32>
    %cst_18 = arith.constant 7.200000e+01 : f32
    %26 = vector.broadcast %cst_18 : f32 to vector<256x1xf32>
    %27 = arith.divf %26, %25 : vector<256x1xf32>
    %cst_19 = arith.constant 0.000000e+00 : f32
    %cst_20 = arith.constant 1.000000e+00 : f32
    %28 = vector.broadcast %cst_19 : f32 to vector<256x1xf32>
    %29 = arith.maximumf %28, %23 : vector<256x1xf32>
    %30 = vector.broadcast %cst_20 : f32 to vector<256x1xf32>
    %31 = arith.minimumf %30, %29 : vector<256x1xf32>
    %32 = arith.mulf %27, %31 : vector<256x1xf32>
    %33 = vector.broadcast %32 : vector<256x1xf32> to vector<256x8xf32>
    %34 = arith.mulf %20, %33 : vector<256x8xf32>
    %c0_21 = arith.constant 0 : index
    %c0_22 = arith.constant 0 : index
    %35 = vector.load %arg5[%c0_21, %c0_22] : memref<1x8xf32, #tpu.memory_space<vmem>>, vector<1x8xf32>
    %36 = vector.broadcast %35 : vector<1x8xf32> to vector<256x8xf32>
    %37 = arith.addf %34, %36 : vector<256x8xf32>
    %38 = vector.broadcast %31 : vector<256x1xf32> to vector<256x8xf32>
    %39 = arith.mulf %37, %38 : vector<256x8xf32>
    %cst_23 = arith.constant dense<0.000000e+00> : vector<8xf32>
    %40 = vector.multi_reduction <add>, %39, %cst_23 [0] : vector<256x8xf32> to vector<8xf32>
    %41 = vector.shape_cast %40 : vector<8xf32> to vector<1x8xf32>
    %42 = vector.shape_cast %41 : vector<1x8xf32> to vector<1x1x1x8xf32>
    %c0_24 = arith.constant 0 : index
    %c0_25 = arith.constant 0 : index
    %c0_26 = arith.constant 0 : index
    %c0_27 = arith.constant 0 : index
    %43 = vector.load %arg7[%c0_24, %c0_25, %c0_26, %c0_27] : memref<1x1x1x8xf32, #tpu.memory_space<vmem>>, vector<1x1x1x8xf32>
    tpu.vector_store %arg7[%c0_24, %c0_25, %c0_26, %c0_27], %42 {strides = array<i32>} : memref<1x1x1x8xf32, #tpu.memory_space<vmem>>, vector<1x1x1x8xf32>,
    %44 = arith.mulf %39, %39 : vector<256x8xf32>
    %cst_28 = arith.constant dense<0.000000e+00> : vector<8xf32>
    %45 = vector.multi_reduction <add>, %44, %cst_28 [0] : vector<256x8xf32> to vector<8xf32>
    %46 = vector.shape_cast %45 : vector<8xf32> to vector<1x8xf32>
    %47 = vector.shape_cast %46 : vector<1x8xf32> to vector<1x1x1x8xf32>
    %c0_29 = arith.constant 0 : index
    %c0_30 = arith.constant 0 : index
    %c0_31 = arith.constant 0 : index
    %c0_32 = arith.constant 0 : index
    %48 = vector.load %arg8[%c0_29, %c0_30, %c0_31, %c0_32] : memref<1x1x1x8xf32, #tpu.memory_space<vmem>>, vector<1x1x1x8xf32>
    tpu.vector_store %arg8[%c0_29, %c0_30, %c0_31, %c0_32], %47 {strides = array<i32>} : memref<1x1x1x8xf32, #tpu.memory_space<vmem>>, vector<1x1x1x8xf32>,
    %49 = vector.shape_cast %39 : vector<256x8xf32> to vector<16x16x8xf32>
    %50 = arith.truncf %49 : vector<16x16x8xf32> to vector<16x16x8xbf16>
    %c0_33 = arith.constant 0 : index
    %c0_34 = arith.constant 0 : index
    %c0_35 = arith.constant 0 : index
    %c0_36 = arith.constant 0 : index
    %51 = vector.load %arg6[%c0_33, %c0_34, %c0_35, %c0_36] : memref<1x16x16x8xbf16, #tpu.memory_space<vmem>>, vector<1x16x16x8xbf16>
    %52 = vector.shape_cast %51 : vector<1x16x16x8xbf16> to vector<16x16x8xbf16>
    %53 = vector.shape_cast %50 : vector<16x16x8xbf16> to vector<1x16x16x8xbf16>
    tpu.vector_store %arg6[%c0_33, %c0_34, %c0_35, %c0_36], %53 {strides = array<i32>} : memref<1x16x16x8xbf16, #tpu.memory_space<vmem>>, vector<1x16x16x8xbf16>,
    return
  }
  func.func @transform_0(%arg0: i32, %arg1: i32) -> (i32, i32, i32, i32) {
    %c0_i32 = arith.constant 0 : i32
    %c0_i32_0 = arith.constant 0 : i32
    %c0_i32_1 = arith.constant 0 : i32
    return %arg0, %arg1, %c0_i32, %c0_i32_0 : i32, i32, i32, i32
  }
  func.func @transform_1(%arg0: i32, %arg1: i32) -> (i32, i32, i32, i32) {
    %c0_i32 = arith.constant 0 : i32
    %c0_i32_0 = arith.constant 0 : i32
    %c0_i32_1 = arith.constant 0 : i32
    return %arg0, %arg1, %c0_i32, %c0_i32_0 : i32, i32, i32, i32
  }
  func.func @transform_2(%arg0: i32, %arg1: i32) -> (i32, i32, i32) {
    %c0_i32 = arith.constant 0 : i32
    %c0_i32_0 = arith.constant 0 : i32
    %c0_i32_1 = arith.constant 0 : i32
    %c0_i32_2 = arith.constant 0 : i32
    return %c0_i32, %c0_i32_0, %c0_i32_1 : i32, i32, i32
  }
  func.func @transform_3(%arg0: i32, %arg1: i32) -> (i32, i32) {
    %c0_i32 = arith.constant 0 : i32
    %c0_i32_0 = arith.constant 0 : i32
    %c0_i32_1 = arith.constant 0 : i32
    return %c0_i32, %c0_i32_0 : i32, i32
  }
  func.func @transform_4(%arg0: i32, %arg1: i32) -> (i32, i32, i32, i32) {
    %c0_i32 = arith.constant 0 : i32
    %c0_i32_0 = arith.constant 0 : i32
    %c0_i32_1 = arith.constant 0 : i32
    return %arg0, %arg1, %c0_i32, %c0_i32_0 : i32, i32, i32, i32
  }
  func.func @transform_5(%arg0: i32, %arg1: i32) -> (i32, i32, i32, i32) {
    %c0_i32 = arith.constant 0 : i32
    %c0_i32_0 = arith.constant 0 : i32
    %c0_i32_1 = arith.constant 0 : i32
    return %arg0, %arg1, %c0_i32, %c0_i32_0 : i32, i32, i32, i32
  }
  func.func @transform_6(%arg0: i32, %arg1: i32) -> (i32, i32, i32, i32) {
    %c0_i32 = arith.constant 0 : i32
    %c0_i32_0 = arith.constant 0 : i32
    %c0_i32_1 = arith.constant 0 : i32
    return %arg0, %arg1, %c0_i32, %c0_i32_0 : i32, i32, i32, i32
  }
}

</mosaic_0001>

<bundles_post_ra>
// kernel: tpu_custom_call.1
= control target key start
LH: loop header
LB: loop body
LE: loop exit
PB: predicated region body
PF: predicated region fallthrough
CT: control target
= control target key end

     0   :  { %12 = vsyncpa [#allocation3], 0  ;;  %s4964_s0 = inlined_call_operand.vmem [shape: bf16[2,16,18,24], index: 0, kind: input, shape index: {}]   ;;  %s4965_s1 = inlined_call_operand.vmem [shape: f32[2,16,16,1], index: 1, kind: input, shape index: {}]   ;;  %s4966_s2 = inlined_call_operand.vmem [shape: bf16[3,24,8], index: 2, kind: input, shape index: {}]   ;;  %s4967_s3 = inlined_call_operand.vmem [shape: f32[1,8], index: 3, kind: input, shape index: {}]   ;;  %s4968_s4 = inlined_call_operand.vmem [shape: bf16[2,16,16,8], index: 4, kind: output, shape index: {0}]   ;;  %s4969_s5 = inlined_call_operand.hbm [shape: f32[2,1,1,8], index: 5, kind: output, shape index: {1}]   ;;  %s4970_s6 = inlined_call_operand.hbm [shape: f32[2,1,1,8], index: 6, kind: output, shape index: {2}]  }
   0x1   :  { %14 = vsyncpa [#allocation3 + $0x1], 0 }
   0x2   :  { %15 = vsyncpa [#allocation5], 0 }
   0x3   :  { %17 = vsyncpa [#allocation5 + $0x1], 0  ;;  %s3684_s21 = smov 0   ;;  %s3686_s22 = smov 0  }
   0x4   :  { %s3688_s23 = smov 0   ;;  %s3690_s24 = smov 0  }
   0x5   :  { %s3692_s25 = smov 0   ;;  %s3694_s26 = smov 0  }
   0x6 LB: > { %s3002_s27 = sadd.s32 4294967295, %s3644_s26   ;;  %s3003_s28 = sadd.s32 4294967294, %s3644_s26   ;;  %s3644_s26 = sphi %s3694_s26, %s23_s26   ;;  %s3640_s25 = sphi %s3692_s25, %s5059_s25   ;;  %s3636_s24 = sphi %s3690_s24, %s5058_s24   ;;  %s3632_s23 = sphi %s3688_s23, %s5057_s23   ;;  %s3628_s22 = sphi %s3686_s22, %s5056_s22   ;;  %s3624_s21 = sphi %s3684_s21, %s5055_s21  }
   0x7   : > { %s35_s29 = sadd.s32 1, %s3640_s25  ;;  %s170_s30 = sadd.s32 1, %s3632_s23 }
   0x8   : > { %p37_p0 = scmp.ge.s32.totalorder %s35_s29, 2  ;;  %p180_p1 = scmp.ne.s32.totalorder %s3632_s23, %s3628_s22 }
   0x9   : > { %p181_p2 = scmp.eq.s32.totalorder %s3002_s27, 1  ;;  %p186_p3 = scmp.ne.s32.totalorder %s3628_s22, %s3624_s21 }
   0xa   : > { %s5061_s29 = smov (%p37_p0, %s35_s29), 0  ;;  %p187_p5 = scmp.eq.s32.totalorder %s3003_s28, 1 }
   0xb   : > { %p3724_p4 = por %p181_p2, %p180_p1  ;;  %s165_s8 = ssub.s32 %s3640_s25, %s5061_s29 }
   0xc   : > { %p3006_p6 = scmp.ge.s32.totalorder %s3644_s26, 1  ;;  %p168_p7 = scmp.eq.s32.totalorder %s165_s8, 0 }
   0xd   : > { %p3731_p8 = por %p187_p5, %p186_p3  ;;  %p267_p9 = scmp.lt.s32.totalorder %s3644_s26, 3 }
   0xe   : > { %s3737_s10 = scalar_select %p168_p7, %s3632_s23, %s170_s30  }
   0xf   : > { %p268_p10 = pnand %p3006_p6, %p267_p9 }
  0x11   : > { %271 = sbr.rel (%p268_p10) target bundleno = 466 (0x1d2), region = 36 }
  0x16   : > { %v3441_v0 = vld [vmem:[%s4966_s2 + $0x14] ss:$0 sps:$4 sm:$0xff]   ;;  %vm907_vm0 = vcmask 1043456   ;;  %v3442_v1 = vld [vmem:[%s4966_s2 + $0xc] sm:$0xff]   ;;  %p326_p11 = scmp.lt.s32.totalorder %s3636_s24, 1  ;;  %v3646_v5 = vmov 0  }
  0x17   : > { %3374 = vmatprep.subr.msk.bf16.mxu1 %vm907_vm0, %v3441_v0  ;;  %3373 = vmatprep.subr.msk.bf16.mxu0 %vm907_vm0, %v3441_v0  ;;  %v909_v2 = vsel %vm907_vm0, %v3441_v0, 0  ;;  %v3443_v3 = vld [vmem:[%s4966_s2 + $0x8] ss:$0 sps:$4 sm:$0xff]   ;;  %v3444_v4 = vld [vmem:[%s4966_s2 + $0x20] ss:$0 sps:$4 sm:$0xff]   ;;  %vm858_vm3 = vcmask 195584  }
  0x18   : > { %3371 = vmatpush3.bf16.msra.mxu1 %v909_v2  ;;  %3262 = vmatpush3.bf16.msra.mxu0 %v909_v2  ;;  %s3750_s15 = scalar_select %p326_p11, %s3636_s24, 1  ;;  %vm410_vm1 = vsmask.f32 3328  ;;  %vm411_vm2 = vsmask.f32 7440  ;;  %v3786_v17 = vsel %vm907_vm0, %v3443_v3, 0 }
  0x19   : > { %3370 = vmatprep.subr.bf16.mxu1 %v3442_v1  ;;  %3263 = vmatprep.subr.bf16.mxu0 %v3442_v1  ;;  %vm3797_vm4 = vmor %vm410_vm1, %vm411_vm2  ;;  %v3802_v36 = vsel %vm907_vm0, %v3444_v4, 0  ;;  %vm1389_vm5 = vcmask 1042432   ;;  %vm1390_vm6 = vcmask 1046532   ;;  %vm2758_vm8 = vcmask 60416   ;;  %s3169_s11 = sshll.u32 %s3636_s24, 4 }
  0x1a   : > { %s3377_s20 = smul.u32 192, %s3750_s15  ;;  %3440 = vset.pattern.permute.xlu1 %v3646_v5  ;;  %3439 = vset.pattern.permute.xlu0 %v3646_v5  ;;  %s3173_s8 = sshll.u32 %s3750_s15, 8  ;;  %vm4107_vm7 = vmor %vm1389_vm5, %vm1390_vm6  ;;  %vm2456_vm9 = vcmask 64512   ;;  %vm2526_vm10 = vcmask 57344  }
  0x1b   : > { %s3820_s13 = scalar_lea.vmem %s4965_s1, %s3173_s8  ;;  %s3174_s27 = sshll.u32 %s3750_s15, 7 }
  0x1c   : > { %3372 = vmatpush3.bf16.msra.mxu1 %v3442_v1  ;;  %3264 = vmatpush3.bf16.msra.mxu0 %v3442_v1  ;;  %s3762_s30 = scalar_lea.vmem %s4964_s0, %s3377_s20  ;;  %v1811_v5 = vld [vmem:[%s3820_s13 + $0x10] sm:$0xff]  ;;  %s4875_s8 = sand.u32 1, %s3628_s22  }
  0x1d   : > { %v3765_v6 = vld [vmem:[%s3762_s30] sm:$0xf]  ;;  %v3768_v7 = vld [vmem:[%s3762_s30 + $0x4] sm:$0xf]  ;;  %v3771_v8 = vld [vmem:[%s3762_s30 + $0x8] sm:$0x1]  ;;  %3375 = vmatprep.subr.msk.bf16.mxu1 %vm907_vm0, %v3443_v3  ;;  %3376 = vmatprep.subr.msk.bf16.mxu0 %vm907_vm0, %v3444_v4  ;;  %s4885_s19 = scalar_lea.hbm %s4969_s5, %s3169_s11 }
  0x1e   : > { %v414_v9 = vshrl.u32 %v3765_v6, 16  ;;  %v417_v10 = vshll.u32 %v3765_v6, 16  ;;  %v423_v11 = vshll.u32 %v3768_v7, 16  ;;  %v427_v12 = vshrl.u32 %v3768_v7, 16  ;;  %v383_v13 = vld [vmem:[%s3762_s30 + $0x60] sm:$0xf] }
  0x1f   : > { %v433_v14 = vshll.u32 %v3771_v8, 16  ;;  %v384_v15 = vld [vmem:[%s3762_s30 + $0x64] sm:$0xf]  ;;  %v3783_v16 = vld [vmem:[%s3762_s30 + $0x68] sm:$0x1]  ;;  %v606_v23 = vshrl.u32 %v383_v13, 16 }
  0x20   : > { %v416_v18 = vrot.slane %v414_v9, 4  ;;  %v419_v19 = vrot.slane %v417_v10, 5  ;;  %v425_v20 = vrot.slane %v423_v11, 5  ;;  %v429_v21 = vrot.slane %v427_v12, 4  ;;  %v3790_v30 = vld [vmem:[%s3762_s30 + $0xc] sm:$0xf] }
  0x21   : > { %v435_v22 = vrot.slane %v433_v14, 5  ;;  %v609_v24 = vshll.u32 %v383_v13, 16  ;;  %v615_v25 = vshll.u32 %v384_v15, 16  ;;  %v619_v28 = vshrl.u32 %v384_v15, 16  ;;  %v3793_v31 = vld [vmem:[%s3762_s30 + $0x10] sm:$0xf] }
  0x22   : > { %v420_v26 = vor.u32 %v419_v19, %v416_v18  ;;  %v430_v27 = vor.u32 %v429_v21, %v425_v20  ;;  %v625_v29 = vshll.u32 %v3783_v16, 16  ;;  %v608_v33 = vrot.slane %v606_v23, 4  ;;  %v3806_v42 = vld [vmem:[%s3762_s30 + $0x14] sm:$0x1]  ;;  %v386_v54 = vld [vmem:[%s3762_s30 + $0x6c] sm:$0xf] }
  0x23   : > { %v611_v34 = vrot.slane %v609_v24, 5  ;;  %v617_v35 = vrot.slane %v615_v25, 5  ;;  %v621_v39 = vrot.slane %v619_v28, 4  ;;  %v438_v43 = vshrl.u32 %v3790_v30, 16  ;;  %v387_v59 = vld [vmem:[%s3762_s30 + $0x70] sm:$0xf] }
  0x24   : > { %v421_v37 = vrot.slane %v420_v26, 4  ;;  %v431_v38 = vrot.slane %v430_v27, 4  ;;  %v627_v40 = vrot.slane %v625_v29, 5  ;;  %v441_v44 = vshll.u32 %v3790_v30, 16  ;;  %v388_v63 = vld [vmem:[%s3762_s30 + $0x74] sm:$0x1] }
  0x25   : > { %v612_v41 = vor.u32 %v611_v34, %v608_v33  ;;  %v447_v45 = vshll.u32 %v3793_v31, 16  ;;  %v622_v48 = vor.u32 %v621_v39, %v617_v35  ;;  %v451_v49 = vshrl.u32 %v3793_v31, 16  ;;  %v1809_v19 = vld [vmem:[%s3820_s13] sm:$0xff]  ;;  %v3839_v24 = vld [vmem:[%s3762_s30 + $0x18] sm:$0xf]  ;;  %s318_s12 = scalar_lea.vmem [#allocation2], %s4875_s8 }
  0x26   : > { %v426_v46 = vsel %vm3797_vm4, %v421_v37, %v425_v20  ;;  %v436_v47 = vsel %vm3797_vm4, %v431_v38, %v435_v22  ;;  %v440_v52 = vrot.slane %v438_v43, 4  ;;  %v443_v53 = vrot.slane %v441_v44, 5  ;;  %v3844_v29 = vld [vmem:[%s3762_s30 + $0x1c] sm:$0xf]  ;;  %s4980_s14 = scalar_lea.vmem [#allocation4], %s4875_s8  ;;  %s2802_s28 = scalar_lea.sflag [#allocation3], %s4875_s8 }
  0x27   : > { %v3015_v50 = vcombine.low %v426_v46, %v436_v47  ;;  %v613_v51 = vrot.slane %v612_v41, 4  ;;  %v623_v55 = vrot.slane %v622_v48, 4  ;;  %v449_v56 = vrot.slane %v447_v45, 5  ;;  %v3446_v37 = vld [vmem:[%s4966_s2 + $0x18] sm:$0xff]   ;;  %v3852_v41 = vld [vmem:[%s3762_s30 + $0x20] sm:$0x1] }
  0x28   : > { %v453_v57 = vrot.slane %v451_v49, 4  ;;  %v457_v58 = vshll.u32 %v3806_v42, 16  ;;  %v444_v62 = vor.u32 %v443_v53, %v440_v52  ;;  %v630_v4 = vshrl.u32 %v386_v54, 16  ;;  %v389_v47 = vld [vmem:[%s3762_s30 + $0x78] sm:$0xf]  ;;  %s2837_s16 = sshll.u32 %s4980_s14, 4  ;;  %s4895_s16 = int_to_ptr.vmem [resolvable:$true] %s2837_s16 }
  0x29   : > { %3265 = vmatprep.mubr.msk.bf16.mxu0 %vm858_vm3, %v3015_v50  ;;  %v618_v61 = vsel %vm3797_vm4, %v613_v51, %v617_v35  ;;  %v628_v1 = vsel %vm3797_vm4, %v623_v55, %v627_v40  ;;  %v633_v11 = vshll.u32 %v386_v54, 16  ;;  %v639_v12 = vshll.u32 %v387_v59, 16  ;;  %v390_v52 = vld [vmem:[%s3762_s30 + $0x7c] sm:$0xf] }
  0x2a   : > { %v454_v2 = vor.u32 %v453_v57, %v449_v56  ;;  %v459_v3 = vrot.slane %v457_v58, 5  ;;  %v3023_v9 = vcombine.low %v618_v61, %v628_v1  ;;  %v445_v10 = vrot.slane %v444_v62, 4  ;;  %v391_v57 = vld [vmem:[%s3762_s30 + $0x80] sm:$0x1]  ;;  %v3871_v62 = vld [vmem:[%s3762_s30 + $0x24] sm:$0xf] }
  0x2b   : > { %v632_v14 = vrot.slane %v630_v4, 4  ;;  %v643_v15 = vshrl.u32 %v387_v59, 16  ;;  %v649_v18 = vshll.u32 %v388_v63, 16  ;;  %v635_v21 = vrot.slane %v633_v11, 5  ;;  %v3445_v4 = vld [vmem:[%s4966_s2] sm:$0xff]  }
  0x2c   : > { %v455_v13 = vrot.slane %v454_v2, 4  ;;  %3281 = vmatprep.mubr.msk.bf16.mxu1 %vm858_vm3, %v3023_v9  ;;  %v450_v20 = vsel %vm3797_vm4, %v445_v10, %v449_v56  ;;  %v641_v22 = vrot.slane %v639_v12, 5  ;;  %v1843_v23 = vadd.f32 1e-08, %v1811_v5  ;;  %v3877_v12 = vld [vmem:[%s3762_s30 + $0x28] sm:$0xf] }
  0x2d   : > { %v645_v26 = vrot.slane %v643_v15, 4  ;;  %v651_v27 = vrot.slane %v649_v18, 5  ;;  %v1939_v28 = vmax.f32 %v1811_v5, 0.0  ;;  %v636_v34 = vor.u32 %v635_v21, %v632_v14 }
  0x2e   : > { %v460_v25 = vsel %vm3797_vm4, %v455_v13, %v459_v3  ;;  %3463 = vrcp.f32 %v1843_v23  ;;  %v1841_v35 = vadd.f32 1e-08, %v1809_v19  ;;  %v1937_v40 = vmax.f32 %v1809_v19, 0.0 }
  0x2f   : > { %v3016_v33 = vcombine.low %v450_v20, %v460_v25  ;;  %v646_v38 = vor.u32 %v645_v26, %v641_v22  ;;  %v3849_v39 = vmin.f32 %v1939_v28, 1.0  ;;  %v462_v43 = vshrl.u32 %v3839_v24, 16 }
  0x30   : > { %v637_v44 = vrot.slane %v636_v34, 4  ;;  %3465 = vrcp.f32 %v1841_v35  ;;  %v465_v45 = vshll.u32 %v3839_v24, 16  ;;  %v471_v46 = vshll.u32 %v3844_v29, 16 }
  0x31   : > { %4985 = vst [vmem:[#allocation8_spill] sm:$0xff] %v3849_v39  ;;  %3266 = vmatmul.mubr.msk.bf16.vlgmr.msra.gmra.mxu0 %vm858_vm3, %v3016_v33  ;;  %v647_v48 = vrot.slane %v646_v38, 4  ;;  %v3860_v49 = vmin.f32 %v1937_v40, 1.0  ;;  %v464_v50 = vrot.slane %v462_v43, 4  ;;  %v475_v51 = vshrl.u32 %v3844_v29, 16 }
  0x32   : > { %3334 = vmatpush3.bf16.msra.mxu0 %v3802_v36  ;;  %v642_v53 = vsel %vm3797_vm4, %v637_v44, %v641_v22  ;;  %v467_v54 = vrot.slane %v465_v45, 5  ;;  %v473_v55 = vrot.slane %v471_v46, 5  ;;  %v481_v56 = vshll.u32 %v3852_v41, 16  ;;  %v3883_v22 = vld [vmem:[%s3762_s30 + $0x2c] sm:$0x1] }
  0x33   : > { %4986 = vst [vmem:[#allocation9_spill] sm:$0xff] %v3860_v49  ;;  %3335 = vmatprep.subr.bf16.mxu0 %v3446_v37  ;;  %v652_v58 = vsel %vm3797_vm4, %v647_v48, %v651_v27  ;;  %v477_v36 = vrot.slane %v475_v51, 4  ;;  %v654_v59 = vshrl.u32 %v389_v47, 16  ;;  %v657_v61 = vshll.u32 %v389_v47, 16  ;;  %v392_v33 = vld [vmem:[%s3762_s30 + $0x84] sm:$0xf] }
  0x34   : > { %v3024_v63 = vcombine.low %v642_v53, %v652_v58  ;;  %v468_v1 = vor.u32 %v467_v54, %v464_v50  ;;  %v483_v2 = vrot.slane %v481_v56, 5  ;;  %v663_v3 = vshll.u32 %v390_v52, 16  ;;  %v393_v45 = vld [vmem:[%s3762_s30 + $0x88] sm:$0xf] }
  0x35   : > { %v478_v5 = vor.u32 %v477_v36, %v473_v55  ;;  %v656_v9 = vrot.slane %v654_v59, 4  ;;  %v659_v10 = vrot.slane %v657_v61, 5  ;;  %v667_v11 = vshrl.u32 %v390_v52, 16  ;;  %v394_v36 = vld [vmem:[%s3762_s30 + $0x8c] sm:$0x1] }
  0x36   : > { %3336 = vmatpush3.bf16.msra.mxu0 %v3446_v37  ;;  %3282 = vmatmul.mubr.msk.bf16.vlgmr.msra.gmra.mxu1 %vm858_vm3, %v3024_v63  ;;  %v469_v13 = vrot.slane %v468_v1, 4  ;;  %v665_v14 = vrot.slane %v663_v3, 5  ;;  %v673_v15 = vshll.u32 %v391_v57, 16  ;;  %v486_v18 = vshrl.u32 %v3871_v62, 16  ;;  %v1812_v63 = vld [vmem:[%s3820_s13 + $0x18] sm:$0xff] }
  0x37   : > { %3298 = vmatpush3.bf16.msra.mxu1 %v3786_v17  ;;  %v479_v19 = vrot.slane %v478_v5, 4  ;;  %v660_v20 = vor.u32 %v659_v10, %v656_v9  ;;  %v669_v21 = vrot.slane %v667_v11, 4  ;;  %v489_v23 = vshll.u32 %v3871_v62, 16  ;;  %v1810_v5 = vld [vmem:[%s3820_s13 + $0x8] sm:$0xff] }
  0x38   : > { %v474_v25 = vsel %vm3797_vm4, %v469_v13, %v473_v55  ;;  %v675_v26 = vrot.slane %v673_v15, 5  ;;  %v488_v27 = vrot.slane %v486_v18, 4  ;;  %v495_v28 = vshll.u32 %v3877_v12, 16  ;;  %3299 = vmatprep.subr.bf16.mxu1 %v3445_v4 }
  0x39   : > { %v484_v17 = vsel %vm3797_vm4, %v479_v19, %v483_v2  ;;  %v661_v34 = vrot.slane %v660_v20, 4  ;;  %v670_v35 = vor.u32 %v669_v21, %v665_v14  ;;  %v491_v37 = vrot.slane %v489_v23, 5 }
  0x3a   : > { %v3017_v38 = vcombine.low %v474_v25, %v484_v17  ;;  %v497_v40 = vrot.slane %v495_v28, 5  ;;  %v499_v43 = vshrl.u32 %v3877_v12, 16  ;;  %v505_v44 = vshll.u32 %v3883_v22, 16  ;;  %v1813_v17 = vld [vmem:[%s3820_s13 + $0x20] sm:$0xff] }
  0x3b   : > { %v3464_v46 = vpop.eup %3463  ;;  %v666_v47 = vsel %vm3797_vm4, %v661_v34, %v665_v14  ;;  %v671_v48 = vrot.slane %v670_v35, 4  ;;  %v492_v50 = vor.u32 %v491_v37, %v488_v27  ;;  %v678_v51 = vshrl.u32 %v392_v33, 16  ;;  %3300 = vmatpush3.bf16.msra.mxu1 %v3445_v4 }
  0x3c   : > { %v1878_v52 = vmul.f32 72.0, %v3464_v46  ;;  %3269 = vmatprep.mubr.msk.bf16.mxu0 %vm858_vm3, %v3017_v38  ;;  %v501_v53 = vrot.slane %v499_v43, 4  ;;  %v507_v54 = vrot.slane %v505_v44, 5  ;;  %v681_v55 = vshll.u32 %v392_v33, 16  ;;  %v3920_v46 = vld [vmem:[%s3762_s30 + $0x34] sm:$0xf] }
  0x3d   : > { %v3466_v56 = vpop.eup %3465  ;;  %v676_v57 = vsel %vm3797_vm4, %v671_v48, %v675_v26  ;;  %v493_v58 = vrot.slane %v492_v50, 4  ;;  %v680_v59 = vrot.slane %v678_v51, 4  ;;  %v687_v61 = vshll.u32 %v393_v45, 16  ;;  %v1814_v26 = vld [vmem:[%s3820_s13 + $0x28] sm:$0xff] }
  0x3e   : > { %v2003_v1 = vmul.f32 %v3849_v39, %v1878_v52  ;;  %v1874_v2 = vmul.f32 72.0, %v3466_v56  ;;  %v3025_v3 = vcombine.low %v666_v47, %v676_v57  ;;  %v502_v4 = vor.u32 %v501_v53, %v497_v40  ;;  %v3926_v52 = vld [vmem:[%s3762_s30 + $0x38] sm:$0x1]  ;;  %v3933_v56 = vld [vmem:[%s3762_s30 + $0x90] sm:$0xf] }
  0x3f   : > { %v498_v9 = vsel %vm3797_vm4, %v493_v58, %v497_v40  ;;  %v683_v10 = vrot.slane %v681_v55, 5  ;;  %v689_v11 = vrot.slane %v687_v61, 5  ;;  %v691_v13 = vshrl.u32 %v393_v45, 16  ;;  %v3915_v40 = vld [vmem:[%s3762_s30 + $0x30] sm:$0xf] }
  0x40   : > { %2045 = vperm.xlu1 %3440, %v2003_v1   ;;  %v2001_v14 = vmul.f32 %v3860_v49, %v1874_v2  ;;  %3285 = vmatprep.mubr.msk.bf16.mxu1 %vm858_vm3, %v3025_v3  ;;  %v503_v15 = vrot.slane %v502_v4, 4  ;;  %v697_v18 = vshll.u32 %v394_v36, 16  ;;  %v1844_v19 = vadd.f32 1e-08, %v1812_v63  ;;  %v3945_v3 = vld [vmem:[%s3762_s30 + $0x98] sm:$0x1] }
  0x41   : > { %v684_v20 = vor.u32 %v683_v10, %v680_v59  ;;  %v693_v21 = vrot.slane %v691_v13, 4  ;;  %v1940_v23 = vmax.f32 %v1812_v63, 0.0  ;;  %v1842_v25 = vadd.f32 1e-08, %v1810_v5  ;;  %v3941_v59 = vld [vmem:[%s3762_s30 + $0x94] sm:$0xf] }
  0x42   : > { %2035 = vperm.xlu0 %3439, %v2001_v14   ;;  %v508_v27 = vsel %vm3797_vm4, %v503_v15, %v507_v54  ;;  %v699_v28 = vrot.slane %v697_v18, 5  ;;  %3467 = vrcp.f32 %v1844_v19  ;;  %v1938_v33 = vmax.f32 %v1810_v5, 0.0  ;;  %v3954_v18 = vld [vmem:[%s3762_s30 + $0x3c] sm:$0xf] }
  0x43   : > { %v3018_v34 = vcombine.low %v498_v9, %v508_v27  ;;  %v685_v35 = vrot.slane %v684_v20, 4  ;;  %v694_v37 = vor.u32 %v693_v21, %v689_v11  ;;  %v3912_v38 = vmin.f32 %v1940_v23, 1.0 }
  0x44   : > { %3469 = vrcp.f32 %v1842_v25  ;;  %v3917_v43 = vmin.f32 %v1938_v33, 1.0  ;;  %v1846_v44 = vadd.f32 1e-08, %v1814_v26  ;;  %v1942_v45 = vmax.f32 %v1814_v26, 0.0  ;;  %v3958_v25 = vld [vmem:[%s3762_s30 + $0x40] sm:$0xf] }
  0x45   : > { %4987 = vst [vmem:[#allocation10_spill] sm:$0xff] %v3912_v38  ;;  %3270 = vmatmul.mubr.msk.bf16.gmra.mxu0 %vm858_vm3, %v3018_v34  ;;  %v690_v47 = vsel %vm3797_vm4, %v685_v35, %v689_v11  ;;  %v695_v48 = vrot.slane %v694_v37, 4  ;;  %v1845_v50 = vadd.f32 1e-08, %v1813_v17  ;;  %v1941_v51 = vmax.f32 %v1813_v17, 0.0 }
  0x46   : > { %4988 = vst [vmem:[#allocation11_spill] sm:$0xff] %v3917_v43  ;;  %3471 = vrcp.f32 %v1846_v44  ;;  %v3928_v53 = vmin.f32 %v1942_v45, 1.0  ;;  %v510_v54 = vshrl.u32 %v3915_v40, 16  ;;  %v513_v55 = vshll.u32 %v3915_v40, 16 }
  0x47   : > { %v700_v57 = vsel %vm3797_vm4, %v695_v48, %v699_v28  ;;  %3473 = vrcp.f32 %v1845_v50  ;;  %v3937_v58 = vmin.f32 %v1941_v51, 1.0  ;;  %v519_v36 = vshll.u32 %v3920_v46, 16 }
  0x48   : > { %4989 = vst [vmem:[#allocation12_spill] sm:$0xff] %v3928_v53  ;;  %v3026_v61 = vcombine.low %v690_v47, %v700_v57  ;;  %v512_v63 = vrot.slane %v510_v54, 4  ;;  %v515_v1 = vrot.slane %v513_v55, 5  ;;  %v523_v2 = vshrl.u32 %v3920_v46, 16  ;;  %v3966_v54 = vld [vmem:[%s3762_s30 + $0x44] sm:$0x1] }
  0x49   : > { %4990 = vst [vmem:[#allocation13_spill] sm:$0xff] %v3937_v58  ;;  %v521_v4 = vrot.slane %v519_v36, 5  ;;  %v529_v5 = vshll.u32 %v3926_v52, 16  ;;  %v702_v9 = vshrl.u32 %v3933_v56, 16  ;;  %v705_v10 = vshll.u32 %v3933_v56, 16 }
  0x4a   : > { %3286 = vmatmul.mubr.msk.bf16.gmra.mxu1 %vm858_vm3, %v3026_v61  ;;  %v516_v11 = vor.u32 %v515_v1, %v512_v63  ;;  %v525_v13 = vrot.slane %v523_v2, 4  ;;  %v711_v14 = vshll.u32 %v3941_v59, 16  ;;  %v715_v15 = vshrl.u32 %v3941_v59, 16 }
  0x4b   : > { %v531_v19 = vrot.slane %v529_v5, 5  ;;  %v704_v20 = vrot.slane %v702_v9, 4  ;;  %v707_v21 = vrot.slane %v705_v10, 5  ;;  %v721_v23 = vshll.u32 %v3945_v3, 16 }
  0x4c   : > { %v517_v26 = vrot.slane %v516_v11, 4  ;;  %v526_v27 = vor.u32 %v525_v13, %v521_v4  ;;  %v713_v28 = vrot.slane %v711_v14, 5  ;;  %v717_v33 = vrot.slane %v715_v15, 4 }
  0x4d   : > { %v708_v17 = vor.u32 %v707_v21, %v704_v20  ;;  %v723_v34 = vrot.slane %v721_v23, 5  ;;  %v534_v35 = vshrl.u32 %v3954_v18, 16  ;;  %v537_v37 = vshll.u32 %v3954_v18, 16 }
  0x4e   : > { %v522_v44 = vsel %vm3797_vm4, %v517_v26, %v521_v4  ;;  %v527_v45 = vrot.slane %v526_v27, 4  ;;  %v718_v47 = vor.u32 %v717_v33, %v713_v28  ;;  %v543_v48 = vshll.u32 %v3958_v25, 16  ;;  %v3972_v4 = vld [vmem:[%s3762_s30 + $0x9c] sm:$0xf]  ;;  %v3982_v33 = vld [vmem:[%s3762_s30 + $0xa0] sm:$0xf] }
  0x4f   : > { %v3468_v50 = vpop.eup %3467  ;;  %v709_v51 = vrot.slane %v708_v17, 4  ;;  %v536_v55 = vrot.slane %v534_v35, 4  ;;  %v539_v57 = vrot.slane %v537_v37, 5  ;;  %v547_v36 = vshrl.u32 %v3958_v25, 16 }
  0x50   : > { %v1880_v61 = vmul.f32 72.0, %v3468_v50  ;;  %v532_v63 = vsel %vm3797_vm4, %v527_v45, %v531_v19  ;;  %v719_v1 = vrot.slane %v718_v47, 4  ;;  %v545_v2 = vrot.slane %v543_v48, 5  ;;  %v1816_v47 = vld [vmem:[%s3820_s13 + $0x38] sm:$0xff] }
  0x51   : > { %v3470_v5 = vpop.eup %3469  ;;  %v3019_v9 = vcombine.low %v522_v44, %v532_v63  ;;  %v714_v10 = vsel %vm3797_vm4, %v709_v51, %v713_v28  ;;  %v540_v11 = vor.u32 %v539_v57, %v536_v55  ;;  %v549_v13 = vrot.slane %v547_v36, 4  ;;  %v3987_v44 = vld [vmem:[%s3762_s30 + $0xa4] sm:$0x1] }
  0x52   : > { %v2004_v14 = vmul.f32 %v3912_v38, %v1880_v61  ;;  %v1876_v15 = vmul.f32 72.0, %v3470_v5  ;;  %v724_v20 = vsel %vm3797_vm4, %v719_v1, %v723_v34  ;;  %v553_v19 = vshll.u32 %v3966_v54, 16  ;;  %v1815_v1 = vld [vmem:[%s3820_s13 + $0x30] sm:$0xff] }
  0x53   : > { %v3472_v21 = vpop.eup %3471  ;;  %3273 = vmatprep.mubr.msk.bf16.mxu0 %vm858_vm3, %v3019_v9  ;;  %v3027_v23 = vcombine.low %v714_v10, %v724_v20  ;;  %v541_v26 = vrot.slane %v540_v11, 4  ;;  %v550_v27 = vor.u32 %v549_v13, %v545_v2  ;;  %v726_v28 = vshrl.u32 %v3972_v4, 16  ;;  %v1818_v11 = vld [vmem:[%s3820_s13 + $0x48] sm:$0xff] }
  0x54   : > { %v3474_v17 = vpop.eup %3473  ;;  %2050 = vperm.xlu1 %3440, %v2004_v14   ;;  %v2002_v35 = vmul.f32 %v3917_v43, %v1876_v15  ;;  %v1884_v37 = vmul.f32 72.0, %v3472_v21  ;;  %v555_v34 = vrot.slane %v553_v19, 5  ;;  %v729_v45 = vshll.u32 %v3972_v4, 16  ;;  %v1817_v19 = vld [vmem:[%s3820_s13 + $0x40] sm:$0xff]  ;;  %v4055_v43 = vld [vmem:[%s3762_s30 + $0x5c] sm:$0x1] }
  0x55   : > { %v1882_v48 = vmul.f32 72.0, %v3474_v17  ;;  %3289 = vmatprep.mubr.msk.bf16.mxu1 %vm858_vm3, %v3027_v23  ;;  %v546_v50 = vsel %vm3797_vm4, %v541_v26, %v545_v2  ;;  %v551_v51 = vrot.slane %v550_v27, 4  ;;  %v728_v55 = vrot.slane %v726_v28, 4 }
  0x56   : > { %2040 = vperm.xlu0 %3439, %v2002_v35   ;;  %v2006_v57 = vmul.f32 %v3928_v53, %v1884_v37  ;;  %v731_v36 = vrot.slane %v729_v45, 5  ;;  %v735_v61 = vshll.u32 %v3982_v33, 16  ;;  %v739_v63 = vshrl.u32 %v3982_v33, 16  ;;  %v4006_v37 = vld [vmem:[%s3762_s30 + $0x48] sm:$0xf] }
  0x57   : > { %v2005_v5 = vmul.f32 %v3937_v58, %v1882_v48  ;;  %v556_v9 = vsel %vm3797_vm4, %v551_v51, %v555_v34  ;;  %v745_v10 = vshll.u32 %v3987_v44, 16  ;;  %v1848_v2 = vadd.f32 1e-08, %v1816_v47 }
  0x58   : > { %2060 = vperm.xlu1 %3440, %v2006_v57   ;;  %v3020_v13 = vcombine.low %v546_v50, %v556_v9  ;;  %v732_v14 = vor.u32 %v731_v36, %v728_v55  ;;  %v737_v15 = vrot.slane %v735_v61, 5  ;;  %v741_v20 = vrot.slane %v739_v63, 4  ;;  %v4011_v50 = vld [vmem:[%s3762_s30 + $0x4c] sm:$0xf]  ;;  %v4018_v57 = vld [vmem:[%s3762_s30 + $0x50] sm:$0x1] }
  0x59   : > { %v747_v21 = vrot.slane %v745_v10, 5  ;;  %3475 = vrcp.f32 %v1848_v2  ;;  %v1944_v23 = vmax.f32 %v1816_v47, 0.0  ;;  %v1847_v26 = vadd.f32 1e-08, %v1815_v1 }
  0x5a   : > { %2055 = vperm.xlu0 %3439, %v2005_v5   ;;  %3274 = vmatmul.mubr.msk.bf16.gmra.mxu0 %vm858_vm3, %v3020_v13  ;;  %v733_v27 = vrot.slane %v732_v14, 4  ;;  %v742_v28 = vor.u32 %v741_v20, %v737_v15  ;;  %v1943_v17 = vmax.f32 %v1815_v1, 0.0  ;;  %v1850_v35 = vadd.f32 1e-08, %v1818_v11  ;;  %v4024_v1 = vld [vmem:[%s3762_s30 + $0xa8] sm:$0xf] }
  0x5b   : > { %v4008_v34 = vmin.f32 %v1944_v23, 1.0  ;;  %3477 = vrcp.f32 %v1847_v26  ;;  %v1946_v45 = vmax.f32 %v1818_v11, 0.0  ;;  %v1849_v48 = vadd.f32 1e-08, %v1817_v19  ;;  %v4032_v11 = vld [vmem:[%s3762_s30 + $0xac] sm:$0xf] }
  0x5c   : > { %v738_v47 = vsel %vm3797_vm4, %v733_v27, %v737_v15  ;;  %v743_v51 = vrot.slane %v742_v28, 4  ;;  %v4015_v55 = vmin.f32 %v1943_v17, 1.0  ;;  %3479 = vrcp.f32 %v1850_v35  ;;  %v4042_v28 = vld [vmem:[%s3762_s30 + $0x54] sm:$0xf] }
  0x5d   : > { %4991 = vst [vmem:[#allocation14_spill] sm:$0xff] %v4008_v34  ;;  %v4020_v36 = vmin.f32 %v1946_v45, 1.0  ;;  %3481 = vrcp.f32 %v1849_v48  ;;  %v1945_v61 = vmax.f32 %v1817_v19, 0.0  ;;  %v558_v63 = vshrl.u32 %v4006_v37, 16  ;;  %v4038_v19 = vld [vmem:[%s3762_s30 + $0xb0] sm:$0x1] }
  0x5e   : > { %v748_v5 = vsel %vm3797_vm4, %v743_v51, %v747_v21  ;;  %v561_v9 = vshll.u32 %v4006_v37, 16  ;;  %v567_v10 = vshll.u32 %v4011_v50, 16  ;;  %v571_v2 = vshrl.u32 %v4011_v50, 16  ;;  %4993 = vst [vmem:[#allocation16_spill] sm:$0xff] %v4038_v19 }
  0x5f   : > { %4992 = vst [vmem:[#allocation15_spill] sm:$0xff] %v4020_v36  ;;  %v3028_v13 = vcombine.low %v738_v47, %v748_v5  ;;  %v4034_v14 = vmin.f32 %v1945_v61, 1.0  ;;  %v560_v15 = vrot.slane %v558_v63, 4  ;;  %v577_v20 = vshll.u32 %v4018_v57, 16  ;;  %v4050_v5 = vld [vmem:[%s3762_s30 + $0x58] sm:$0xf] }
  0x60   : > { %v563_v23 = vrot.slane %v561_v9, 5  ;;  %v569_v26 = vrot.slane %v567_v10, 5  ;;  %v573_v21 = vrot.slane %v571_v2, 4  ;;  %v750_v27 = vshrl.u32 %v4024_v1, 16 }
  0x61   : > { %3290 = vmatmul.mubr.msk.bf16.gmra.mxu1 %vm858_vm3, %v3028_v13  ;;  %v579_v17 = vrot.slane %v577_v20, 5  ;;  %v753_v35 = vshll.u32 %v4024_v1, 16  ;;  %v759_v45 = vshll.u32 %v4032_v11, 16  ;;  %v763_v48 = vshrl.u32 %v4032_v11, 16 }
  0x62   : > { %v564_v47 = vor.u32 %v563_v23, %v560_v15  ;;  %v574_v51 = vor.u32 %v573_v21, %v569_v26  ;;  %v752_v61 = vrot.slane %v750_v27, 4  ;;  %v769_v63 = vshll.u32 %v4038_v19, 16  ;;  %v4065_v19 = vld [vmem:[%s3762_s30 + $0xb4] sm:$0xf] }
  0x63   : > { %v755_v9 = vrot.slane %v753_v35, 5  ;;  %v761_v10 = vrot.slane %v759_v45, 5  ;;  %v765_v2 = vrot.slane %v763_v48, 4  ;;  %v582_v13 = vshrl.u32 %v4042_v28, 16 }
  0x64   : > { %v565_v20 = vrot.slane %v564_v47, 4  ;;  %v575_v60 = vrot.slane %v574_v51, 4  ;;  %v771_v0 = vrot.slane %v769_v63, 5  ;;  %v585_v53 = vshll.u32 %v4042_v28, 16 }
  0x65   : > { %v756_v38 = vor.u32 %v755_v9, %v752_v61  ;;  %v766_v58 = vor.u32 %v765_v2, %v761_v10  ;;  %v584_v15 = vrot.slane %v582_v13, 4  ;;  %v591_v23 = vshll.u32 %v4050_v5, 16 }
  0x66   : > { %v3476_v21 = vpop.eup %3475  ;;  %v570_v27 = vsel %vm3797_vm4, %v565_v20, %v569_v26  ;;  %v580_v35 = vsel %vm3797_vm4, %v575_v60, %v579_v17  ;;  %v587_v45 = vrot.slane %v585_v53, 5  ;;  %v595_v48 = vshrl.u32 %v4050_v5, 16 }
  0x67   : > { %v1888_v47 = vmul.f32 72.0, %v3476_v21  ;;  %v3021_v51 = vcombine.low %v570_v27, %v580_v35  ;;  %v757_v61 = vrot.slane %v756_v38, 4  ;;  %v767_v63 = vrot.slane %v766_v58, 4  ;;  %v4074_v27 = vld [vmem:[%s3762_s30 + $0xb8] sm:$0xf] }
  0x68   : > { %v3478_v9 = vpop.eup %3477  ;;  %v588_v2 = vor.u32 %v587_v45, %v584_v15  ;;  %v593_v13 = vrot.slane %v591_v23, 5  ;;  %v597_v39 = vrot.slane %v595_v48, 4  ;;  %v601_v49 = vshll.u32 %v4055_v43, 16 }
  0x69   : > { %v3480_v26 = vpop.eup %3479  ;;  %v2008_v20 = vmul.f32 %v4008_v34, %v1888_v47  ;;  %v1886_v60 = vmul.f32 72.0, %v3478_v9  ;;  %3277 = vmatprep.mubr.msk.bf16.mxu0 %vm858_vm3, %v3021_v51  ;;  %v762_v38 = vsel %vm3797_vm4, %v757_v61, %v761_v10  ;;  %v772_v53 = vsel %vm3797_vm4, %v767_v63, %v771_v0  ;;  %v4078_v10 = vld [vmem:[%s3762_s30 + $0xbc] sm:$0x1] }
  0x6a   : > { %v3482_v58 = vpop.eup %3481  ;;  %v1892_v17 = vmul.f32 72.0, %v3480_v26  ;;  %v3029_v15 = vcombine.low %v762_v38, %v772_v53  ;;  %v589_v23 = vrot.slane %v588_v2, 4  ;;  %v598_v21 = vor.u32 %v597_v39, %v593_v13  ;;  %v1820_v0 = vld [vmem:[%s3820_s13 + $0x58] sm:$0xff] }
  0x6b   : > { %2070 = vperm.xlu1 %3440, %v2008_v20   ;;  %v2007_v35 = vmul.f32 %v4015_v55, %v1886_v60  ;;  %v1890_v45 = vmul.f32 72.0, %v3482_v58  ;;  %v603_v48 = vrot.slane %v601_v49, 5  ;;  %v774_v47 = vshrl.u32 %v4065_v19, 16  ;;  %v1819_v20 = vld [vmem:[%s3820_s13 + $0x50] sm:$0xff]  ;;  %v1822_v58 = vld [vmem:[%s3820_s13 + $0x68] sm:$0xff] }
  0x6c   : > { %v2010_v51 = vmul.f32 %v4020_v36, %v1892_v17  ;;  %3293 = vmatprep.mubr.msk.bf16.mxu1 %vm858_vm3, %v3029_v15  ;;  %v594_v39 = vsel %vm3797_vm4, %v589_v23, %v593_v13  ;;  %v599_v61 = vrot.slane %v598_v21, 4  ;;  %v777_v63 = vshll.u32 %v4065_v19, 16 }
  0x6d   : > { %2065 = vperm.xlu0 %3439, %v2007_v35   ;;  %v2009_v49 = vmul.f32 %v4034_v14, %v1890_v45  ;;  %v776_v9 = vrot.slane %v774_v47, 4  ;;  %v783_v2 = vshll.u32 %v4074_v27, 16  ;;  %v787_v26 = vshrl.u32 %v4074_v27, 16  ;;  %v1821_v35 = vld [vmem:[%s3820_s13 + $0x60] sm:$0xff]  ;;  %v1826_v45 = vld [vmem:[%s3820_s13 + $0x88] sm:$0xff] }
  0x6e   : > { %v604_v60 = vsel %vm3797_vm4, %v599_v61, %v603_v48  ;;  %v779_v38 = vrot.slane %v777_v63, 5  ;;  %v793_v53 = vshll.u32 %v4078_v10, 16  ;;  %v1852_v13 = vadd.f32 1e-08, %v1820_v0 }
  0x6f   : > { %2080 = vperm.xlu1 %3440, %v2010_v51   ;;  %v3022_v17 = vcombine.low %v594_v39, %v604_v60  ;;  %v785_v15 = vrot.slane %v783_v2, 5  ;;  %v789_v23 = vrot.slane %v787_v26, 4  ;;  %v1948_v21 = vmax.f32 %v1820_v0, 0.0  ;;  %v1824_v60 = vld [vmem:[%s3820_s13 + $0x78] sm:$0xff] }
  0x70   : > { %v780_v47 = vor.u32 %v779_v38, %v776_v9  ;;  %3483 = vrcp.f32 %v1852_v13  ;;  %v1851_v36 = vadd.f32 1e-08, %v1819_v20  ;;  %v795_v61 = vrot.slane %v793_v53, 5 }
  0x71   : > { %2075 = vperm.xlu0 %3439, %v2009_v49   ;;  %3278 = vmatmul.mubr.msk.bf16.gmra.mxu0 %vm858_vm3, %v3022_v17  ;;  %v790_v48 = vor.u32 %v789_v23, %v785_v15  ;;  %v1947_v63 = vmax.f32 %v1819_v20, 0.0  ;;  %v1854_v34 = vadd.f32 1e-08, %v1822_v58  ;;  %v1401_v51 = vrot.slane %v3793_v31, 5  ;;  %v5007_v20 = vld [vmem:[#allocation15_spill] sm:$0xff] }
  0x72   : > { %v781_v39 = vrot.slane %v780_v47, 4  ;;  %3485 = vrcp.f32 %v1851_v36  ;;  %v1853_v0 = vadd.f32 1e-08, %v1821_v35  ;;  %v1404_v2 = vrot.slane %v3806_v42, 5  ;;  %v1823_v42 = vld [vmem:[%s3820_s13 + $0x70] sm:$0xff] }
  0x73   : > { %v791_v26 = vrot.slane %v790_v48, 4  ;;  %v4100_v9 = vmin.f32 %v1948_v21, 1.0  ;;  %3487 = vrcp.f32 %v1854_v34  ;;  %v1950_v38 = vmax.f32 %v1822_v58, 0.0 }
  0x74   : > { %v786_v49 = vsel %vm3797_vm4, %v781_v39, %v785_v15  ;;  %3489 = vrcp.f32 %v1853_v0  ;;  %v3083_v36 = vrot.slane %v3765_v6, 9  ;;  %v4115_v34 = vmin.f32 %v1947_v63, 1.0  ;;  %v1825_v63 = vld [vmem:[%s3820_s13 + $0x80] sm:$0xff] }
  0x75   : > { %v796_v53 = vsel %vm3797_vm4, %v791_v26, %v795_v61  ;;  %v1949_v13 = vmax.f32 %v1821_v35, 0.0  ;;  %v1394_v58 = vrot.slane %v3768_v7, 5  ;;  %v3084_v15 = vrot.slane %v3790_v30, 9 }
  0x76   : > { %v3030_v17 = vcombine.low %v786_v49, %v796_v53  ;;  %v1403_v23 = vrot.slane %v1401_v51, 4  ;;  %v1856_v21 = vadd.f32 1e-08, %v1824_v60  ;;  %v1952_v39 = vmax.f32 %v1824_v60, 0.0 }
  0x77   : > { %v1395_v47 = vsel %vm4107_vm7, %v3083_v36, %v1394_v58  ;;  %v1396_v48 = vrot.slane %v1394_v58, 4  ;;  %v1855_v0 = vadd.f32 1e-08, %v1823_v42  ;;  %v1402_v32 = vsel %vm4107_vm7, %v3084_v15, %v1401_v51 }
  0x78   : > { %3294 = vmatmul.mubr.msk.bf16.gmra.mxu1 %vm858_vm3, %v3030_v17  ;;  %v1405_v35 = vsel %vm4107_vm7, %v1403_v23, %v1404_v2  ;;  %3491 = vrcp.f32 %v1856_v21  ;;  %v1951_v61 = vmax.f32 %v1823_v42, 0.0  ;;  %v4128_v26 = vmin.f32 %v1950_v38, 1.0  ;;  %v1828_v23 = vld [vmem:[%s3820_s13 + $0x98] sm:$0xff]  ;;  %v4152_v21 = vld [vmem:[%s3820_s13 + $0x90] sm:$0xff] }
  0x79   : > { %v4996_v49 = vcombine.low %v3765_v6, %v3768_v7  ;;  %v4997_v60 = vrot.slane %v3771_v8, 5  ;;  %v3103_v51 = vcombine.low %v1402_v32, %v1405_v35  ;;  %3493 = vrcp.f32 %v1855_v0 }
  0x7a   : > { %v4138_v2 = vmin.f32 %v1949_v13, 1.0  ;;  %v3050_v38 = vcombine.low %v3790_v30, %v3793_v31  ;;  %v1858_v53 = vadd.f32 1e-08, %v1826_v45  ;;  %v4142_v58 = vmin.f32 %v1952_v39, 1.0 }
  0x7b   : > { %3301 = vmatprep.mubr.msk.bf16.mxu1 %vm858_vm3, %v4996_v49  ;;  %v1398_v36 = vsel %vm4107_vm7, %v1396_v48, %v4997_v60  ;;  %v4144_v6 = vmin.f32 %v1951_v61, 1.0  ;;  %v1857_v7 = vadd.f32 1e-08, %v1825_v63  ;;  %v3085_v8 = vrot.slane %v3839_v24, 9 }
  0x7c   : > { %v3102_v42 = vcombine.low %v1395_v47, %v1398_v36  ;;  %3495 = vrcp.f32 %v1858_v53  ;;  %v1954_v17 = vmax.f32 %v1826_v45, 0.0  ;;  %v1408_v15 = vrot.slane %v3844_v29, 5 }
  0x7d   : > { %v1411_v13 = vrot.slane %v3852_v41, 5  ;;  %v3484_v30 = vpop.eup %3483  ;;  %3497 = vrcp.f32 %v1857_v7  ;;  %v1953_v31 = vmax.f32 %v1825_v63, 0.0  ;;  %v3051_v47 = vcombine.low %v3839_v24, %v3844_v29 }
  0x7e   : > { %3337 = vmatprep.mubr.msk.bf16.mxu0 %vm858_vm3, %v3102_v42  ;;  %v3086_v48 = vrot.slane %v3871_v62, 9  ;;  %v1896_v39 = vmul.f32 72.0, %v3484_v30  ;;  %v1409_v45 = vsel %vm4107_vm7, %v3085_v8, %v1408_v15  ;;  %v1410_v0 = vrot.slane %v1408_v15, 4  ;;  %v4170_v42 = vld [vmem:[%s3820_s13 + $0xa8] sm:$0xff]  ;;  %v4174_v15 = vld [vmem:[%s3820_s13 + $0xa0] sm:$0xff] }
  0x7f   : > { %3338 = vmatmul.mubr.msk.bf16.vlgmr.msra.gmra.mxu0 %vm858_vm3, %v3103_v51  ;;  %v1415_v41 = vrot.slane %v3877_v12, 5  ;;  %v3486_v32 = vpop.eup %3485  ;;  %v1418_v35 = vrot.slane %v3883_v22, 5  ;;  %v1860_v61 = vadd.f32 1e-08, %v1828_v23  ;;  %v1956_v49 = vmax.f32 %v1828_v23, 0.0 }
  0x80   : > { %v1859_v63 = vadd.f32 1e-08, %v4152_v21  ;;  %v3488_v60 = vpop.eup %3487  ;;  %v2012_v24 = vmul.f32 %v4100_v9, %v1896_v39  ;;  %v1894_v29 = vmul.f32 72.0, %v3486_v32  ;;  %3302 = vmatmul.mubr.msk.bf16.vlgmr.msra.gmra.mxu1 %vm858_vm3, %v3050_v38  ;;  %v1412_v36 = vsel %vm4107_vm7, %v1410_v0, %v1411_v13 }
  0x81   : > { %v1416_v51 = vsel %vm4107_vm7, %v3086_v48, %v1415_v41  ;;  %v3490_v22 = vpop.eup %3489  ;;  %v1900_v53 = vmul.f32 72.0, %v3488_v60  ;;  %3305 = vmatprep.mubr.msk.bf16.mxu1 %vm858_vm3, %v3051_v47  ;;  %v3104_v7 = vcombine.low %v1409_v45, %v1412_v36  ;;  %v1417_v8 = vrot.slane %v1415_v41, 4  ;;  %v1832_v36 = vld [vmem:[%s3820_s13 + $0xb8] sm:$0xff] }
  0x82   : > { %3499 = vrcp.f32 %v1860_v61  ;;  %2090 = vperm.xlu1 %3440, %v2012_v24   ;;  %v2011_v38 = vmul.f32 %v4115_v34, %v1894_v29  ;;  %v1898_v23 = vmul.f32 72.0, %v3490_v22  ;;  %v4177_v30 = vmin.f32 %v1954_v17, 1.0 }
  0x83   : > { %3501 = vrcp.f32 %v1859_v63  ;;  %v2014_v13 = vmul.f32 %v4128_v26, %v1900_v53  ;;  %v4180_v48 = vmin.f32 %v1953_v31, 1.0  ;;  %3341 = vmatprep.mubr.msk.bf16.mxu0 %vm858_vm3, %v3104_v7  ;;  %v1419_v47 = vsel %vm4107_vm7, %v1417_v8, %v1418_v35  ;;  %v4209_v53 = vld [vmem:[%s3820_s13 + $0xb0] sm:$0xff] }
  0x84   : > { %v1862_v39 = vadd.f32 1e-08, %v4170_v42  ;;  %2085 = vperm.xlu0 %3439, %v2011_v38   ;;  %v2013_v45 = vmul.f32 %v4138_v2, %v1898_v23  ;;  %v3052_v0 = vcombine.low %v3871_v62, %v3877_v12  ;;  %v3105_v17 = vcombine.low %v1416_v51, %v1419_v47 }
  0x85   : > { %v1861_v41 = vadd.f32 1e-08, %v4174_v15  ;;  %v3492_v32 = vpop.eup %3491  ;;  %v4190_v31 = vmin.f32 %v1956_v49, 1.0  ;;  %v1955_v61 = vmax.f32 %v4152_v21, 0.0  ;;  %v3053_v35 = vcombine.low %v3915_v40, %v3920_v46 }
  0x86   : > { %3503 = vrcp.f32 %v1862_v39  ;;  %v3494_v63 = vpop.eup %3493  ;;  %2100 = vperm.xlu1 %3440, %v2014_v13   ;;  %v1904_v60 = vmul.f32 72.0, %v3492_v32  ;;  %v1958_v62 = vmax.f32 %v4170_v42, 0.0  ;;  %v3087_v12 = vrot.slane %v3915_v40, 9 }
  0x87   : > { %3342 = vmatmul.mubr.msk.bf16.gmra.mxu0 %vm858_vm3, %v3105_v17  ;;  %3505 = vrcp.f32 %v1861_v41  ;;  %v1902_v24 = vmul.f32 72.0, %v3494_v63  ;;  %v1957_v49 = vmax.f32 %v4174_v15, 0.0  ;;  %v1422_v21 = vrot.slane %v3920_v46, 5  ;;  %v4222_v17 = vld [vmem:[%s3820_s13 + $0xc8] sm:$0xff]  ;;  %v4225_v41 = vld [vmem:[%s3820_s13 + $0xc0] sm:$0xff] }
  0x88   : > { %v1425_v29 = vrot.slane %v3926_v52, 5  ;;  %2095 = vperm.xlu0 %3439, %v2013_v45   ;;  %v2016_v51 = vmul.f32 %v4142_v58, %v1904_v60  ;;  %3306 = vmatmul.mubr.msk.bf16.gmra.mxu1 %vm858_vm3, %v3052_v0  ;;  %v3054_v22 = vcombine.low %v3954_v18, %v3958_v25  ;;  %v3088_v42 = vrot.slane %v3954_v18, 9 }
  0x89   : > { %v1429_v40 = vrot.slane %v3958_v25, 5  ;;  %v3496_v7 = vpop.eup %3495  ;;  %v2015_v46 = vmul.f32 %v4144_v6, %v1902_v24  ;;  %3309 = vmatprep.mubr.msk.bf16.mxu1 %vm858_vm3, %v3053_v35  ;;  %v1423_v52 = vsel %vm4107_vm7, %v3087_v12, %v1422_v21  ;;  %v1424_v8 = vrot.slane %v1422_v21, 4 }
  0x8a   : > { %v1432_v15 = vrot.slane %v3966_v54, 5  ;;  %v3498_v38 = vpop.eup %3497  ;;  %2110 = vperm.xlu1 %3440, %v2016_v51   ;;  %v1908_v18 = vmul.f32 72.0, %v3496_v7  ;;  %v1864_v13 = vadd.f32 1e-08, %v1832_v36  ;;  %v1960_v45 = vmax.f32 %v1832_v36, 0.0 }
  0x8b   : > { %v1430_v25 = vsel %vm4107_vm7, %v3088_v42, %v1429_v40  ;;  %v1431_v23 = vrot.slane %v1429_v40, 4  ;;  %v1906_v47 = vmul.f32 72.0, %v3498_v38  ;;  %v1426_v39 = vsel %vm4107_vm7, %v1424_v8, %v1425_v29 }
  0x8c   : > { %v1863_v0 = vadd.f32 1e-08, %v4209_v53  ;;  %2105 = vperm.xlu0 %3439, %v2015_v46   ;;  %v2018_v54 = vmul.f32 %v4177_v30, %v1908_v18  ;;  %v3106_v32 = vcombine.low %v1423_v52, %v1426_v39  ;;  %3507 = vrcp.f32 %v1864_v13 }
  0x8d   : > { %v1433_v35 = vsel %vm4107_vm7, %v1431_v23, %v1432_v15  ;;  %v2017_v63 = vmul.f32 %v4180_v48, %v1906_v47  ;;  %v4231_v60 = vmin.f32 %v1955_v61, 1.0  ;;  %v4233_v21 = vmin.f32 %v1958_v62, 1.0 }
  0x8e   : > { %v3107_v12 = vcombine.low %v1430_v25, %v1433_v35  ;;  %3509 = vrcp.f32 %v1863_v0  ;;  %2120 = vperm.xlu1 %3440, %v2018_v54   ;;  %v4235_v29 = vmin.f32 %v1957_v49, 1.0  ;;  %3345 = vmatprep.mubr.msk.bf16.mxu0 %vm858_vm3, %v3106_v32  ;;  %v1866_v36 = vadd.f32 1e-08, %v4222_v17  ;;  %v4263_v0 = vld [vmem:[%s3820_s13 + $0xd0] sm:$0xff]  ;;  %v4267_v32 = vld [vmem:[%s3820_s13 + $0xe0] sm:$0xff] }
  0x8f   : > { %v3500_v24 = vpop.eup %3499  ;;  %v1865_v51 = vadd.f32 1e-08, %v4225_v41  ;;  %v4241_v61 = vmin.f32 %v1960_v45, 1.0  ;;  %v3055_v7 = vcombine.low %v4006_v37, %v4011_v50  ;;  %v3089_v62 = vrot.slane %v4006_v37, 9  ;;  %v1836_v37 = vld [vmem:[%s3820_s13 + $0xd8] sm:$0xff] }
  0x90   : > { %v3502_v42 = vpop.eup %3501  ;;  %v1912_v40 = vmul.f32 72.0, %v3500_v24  ;;  %3346 = vmatmul.mubr.msk.bf16.gmra.mxu0 %vm858_vm3, %v3107_v12  ;;  %2115 = vperm.xlu0 %3439, %v2017_v63   ;;  %v1959_v46 = vmax.f32 %v4209_v53, 0.0  ;;  %3511 = vrcp.f32 %v1866_v36  ;;  %v1962_v52 = vmax.f32 %v4222_v17, 0.0 }
  0x91   : > { %v1910_v49 = vmul.f32 72.0, %v3502_v42  ;;  %3310 = vmatmul.mubr.msk.bf16.gmra.mxu1 %vm858_vm3, %v3054_v22  ;;  %3513 = vrcp.f32 %v1865_v51  ;;  %v1961_v15 = vmax.f32 %v4225_v41, 0.0  ;;  %v1436_v38 = vrot.slane %v4011_v50, 5 }
  0x92   : > { %v2020_v8 = vmul.f32 %v4190_v31, %v1912_v40  ;;  %3313 = vmatprep.mubr.msk.bf16.mxu1 %vm858_vm3, %v3055_v7  ;;  %v1439_v22 = vrot.slane %v4018_v57, 5  ;;  %v3056_v53 = vcombine.low %v4042_v28, %v4050_v5  ;;  %v3090_v23 = vrot.slane %v4042_v28, 9 }
  0x93   : > { %v3504_v18 = vpop.eup %3503  ;;  %v2019_v25 = vmul.f32 %v4231_v60, %v1910_v49  ;;  %v1437_v39 = vsel %vm4107_vm7, %v3089_v62, %v1436_v38  ;;  %v1438_v45 = vrot.slane %v1436_v38, 4  ;;  %v1443_v50 = vrot.slane %v4050_v5, 5  ;;  %v3527_v49 = vld [vmem:[%s3762_s30 + $0x60] sm:$0xf] }
  0x94   : > { %v3506_v13 = vpop.eup %3505  ;;  %2130 = vperm.xlu1 %3440, %v2020_v8   ;;  %v1916_v47 = vmul.f32 72.0, %v3504_v18  ;;  %v1446_v57 = vrot.slane %v4055_v43, 5  ;;  %v1868_v41 = vadd.f32 1e-08, %v1836_v37  ;;  %v1964_v54 = vmax.f32 %v1836_v37, 0.0 }
  0x95   : > { %2125 = vperm.xlu0 %3439, %v2019_v25   ;;  %v1914_v17 = vmul.f32 72.0, %v3506_v13  ;;  %v1440_v35 = vsel %vm4107_vm7, %v1438_v45, %v1439_v22  ;;  %v1444_v63 = vsel %vm4107_vm7, %v3090_v23, %v1443_v50  ;;  %v1445_v5 = vrot.slane %v1443_v50, 4  ;;  %v3529_v13 = vld [vmem:[%s3762_s30 + $0x6c] sm:$0xf]  ;;  %v3530_v50 = vld [vmem:[%s3762_s30 + $0x70] sm:$0xf] }
  0x96   : > { %v2022_v28 = vmul.f32 %v4233_v21, %v1916_v47  ;;  %v4275_v24 = vmin.f32 %v1959_v46, 1.0  ;;  %v3108_v43 = vcombine.low %v1437_v39, %v1440_v35  ;;  %3515 = vrcp.f32 %v1868_v41  ;;  %v3528_v46 = vld [vmem:[%s3762_s30 + $0x64] sm:$0xf]  ;;  %v3531_v41 = vld [vmem:[%s3762_s30 + $0x74] sm:$0x1] }
  0x97   : > { %v2021_v12 = vmul.f32 %v4235_v29, %v1914_v17  ;;  %v4277_v36 = vmin.f32 %v1962_v52, 1.0  ;;  %v1447_v51 = vsel %vm4107_vm7, %v1445_v5, %v1446_v57  ;;  %v1867_v42 = vadd.f32 1e-08, %v4263_v0 }
  0x98   : > { %2140 = vperm.xlu1 %3440, %v2022_v28   ;;  %v1869_v40 = vadd.f32 1e-08, %v4267_v32  ;;  %v4283_v7 = vmin.f32 %v1961_v15, 1.0  ;;  %3349 = vmatprep.mubr.msk.bf16.mxu0 %vm858_vm3, %v3108_v43  ;;  %v3109_v62 = vcombine.low %v1444_v63, %v1447_v51  ;;  %v3057_v8 = vcombine.low %v3527_v49, %v3528_v46  ;;  %v3532_v28 = vld [vmem:[%s3762_s30 + $0x78] sm:$0xf] }
  0x99   : > { %2135 = vperm.xlu0 %3439, %v2021_v12   ;;  %v3091_v38 = vrot.slane %v3527_v49, 9  ;;  %v3508_v52 = vpop.eup %3507  ;;  %3314 = vmatmul.mubr.msk.bf16.gmra.mxu1 %vm858_vm3, %v3056_v53  ;;  %v4289_v37 = vmin.f32 %v1964_v54, 1.0  ;;  %3517 = vrcp.f32 %v1867_v42  ;;  %v1963_v18 = vmax.f32 %v4263_v0, 0.0  ;;  %v3533_v49 = vld [vmem:[%s3762_s30 + $0x7c] sm:$0xf] }
  0x9a   : > { %v1450_v25 = vrot.slane %v3528_v46, 5  ;;  %v1920_v22 = vmul.f32 72.0, %v3508_v52  ;;  %3350 = vmatmul.mubr.msk.bf16.gmra.mxu0 %vm858_vm3, %v3109_v62  ;;  %3519 = vrcp.f32 %v1869_v40  ;;  %v1965_v23 = vmax.f32 %v4267_v32, 0.0  ;;  %3317 = vmatprep.mubr.msk.bf16.mxu1 %vm858_vm3, %v3057_v8  ;;  %v3534_v8 = vld [vmem:[%s3762_s30 + $0x80] sm:$0x1] }
  0x9b   : > { %v3510_v15 = vpop.eup %3509  ;;  %v3092_v53 = vrot.slane %v3529_v13, 9  ;;  %v1457_v0 = vrot.slane %v3530_v50, 5  ;;  %v3058_v57 = vcombine.low %v3529_v13, %v3530_v50  ;;  %v1460_v54 = vrot.slane %v3531_v41, 5  ;;  %v3537_v41 = vld [vmem:[%s3762_s30 + $0x8c] sm:$0x1] }
  0x9c   : > { %v1918_v47 = vmul.f32 72.0, %v3510_v15  ;;  %v1451_v39 = vsel %vm4107_vm7, %v3091_v38, %v1450_v25  ;;  %v1452_v45 = vrot.slane %v1450_v25, 4  ;;  %v2024_v17 = vmul.f32 %v4241_v61, %v1920_v22  ;;  %v3535_v15 = vld [vmem:[%s3762_s30 + $0x84] sm:$0xf] }
  0x9d   : > { %v3093_v32 = vrot.slane %v3532_v28, 9  ;;  %v3512_v35 = vpop.eup %3511  ;;  %v4998_v5 = vrot.slane %v3783_v16, 5  ;;  %v1458_v43 = vsel %vm4107_vm7, %v3092_v53, %v1457_v0  ;;  %v1459_v51 = vrot.slane %v1457_v0, 4  ;;  %v3536_v0 = vld [vmem:[%s3762_s30 + $0x88] sm:$0xf]  ;;  %s4562_s30 = scalar_lea.vmem %s4968_s4, %s3174_s27  ;;  %s4893_s27 = scalar_lea.hbm %s4970_s6, %s3169_s11 }
  0x9e   : > { %v2023_v63 = vmul.f32 %v4275_v24, %v1918_v47  ;;  %v3514_v42 = vpop.eup %3513  ;;  %2150 = vperm.xlu1 %3440, %v2024_v17   ;;  %v1924_v40 = vmul.f32 72.0, %v3512_v35  ;;  %v1464_v46 = vrot.slane %v3533_v49, 5  ;;  %v1467_v38 = vrot.slane %v3534_v8, 5 }
  0x9f   : > { %v1454_v12 = vsel %vm4107_vm7, %v1452_v45, %v4998_v5  ;;  %v1922_v16 = vmul.f32 72.0, %v3514_v42  ;;  %v1461_v52 = vsel %vm4107_vm7, %v1459_v51, %v1460_v54  ;;  %v3059_v25 = vcombine.low %v3532_v28, %v3533_v49 }
  0xa0   : > { %v3110_v62 = vcombine.low %v1451_v39, %v1454_v12  ;;  %2145 = vperm.xlu0 %3439, %v2023_v63   ;;  %v3094_v22 = vrot.slane %v3535_v15, 9  ;;  %v2026_v13 = vmul.f32 %v4277_v36, %v1924_v40  ;;  %v3111_v53 = vcombine.low %v1458_v43, %v1461_v52 }
  0xa1   : > { %v1465_v47 = vsel %vm4107_vm7, %v3093_v32, %v1464_v46  ;;  %v1466_v39 = vrot.slane %v1464_v46, 4  ;;  %v2025_v45 = vmul.f32 %v4283_v7, %v1922_v16  ;;  %v4319_v50 = vmin.f32 %v1963_v18, 1.0  ;;  %3318 = vmatmul.mubr.msk.bf16.gmra.mxu1 %vm858_vm3, %v3058_v57 }
  0xa2   : > { %3353 = vmatprep.mubr.msk.bf16.mxu0 %vm858_vm3, %v3110_v62  ;;  %v1471_v17 = vrot.slane %v3536_v0, 5  ;;  %v1474_v54 = vrot.slane %v3537_v41, 5  ;;  %2160 = vperm.xlu1 %3440, %v2026_v13   ;;  %v3095_v35 = vrot.slane %v3933_v56, 9  ;;  %v1478_v32 = vrot.slane %v3941_v59, 5 }
  0xa3   : > { %3354 = vmatmul.mubr.msk.bf16.gmra.mxu0 %vm858_vm3, %v3111_v53  ;;  %v1468_v28 = vsel %vm4107_vm7, %v1466_v39, %v1467_v38  ;;  %v1481_v63 = vrot.slane %v3945_v3, 5  ;;  %v3516_v18 = vpop.eup %3515  ;;  %v4330_v5 = vmin.f32 %v1965_v23, 1.0  ;;  %3321 = vmatprep.mubr.msk.bf16.mxu1 %vm858_vm3, %v3059_v25  ;;  %v3060_v42 = vcombine.low %v3535_v15, %v3536_v0  ;;  %v4999_v39 = vld [vmem:[#allocation16_spill] sm:$0xff] }
  0xa4   : > { %2155 = vperm.xlu0 %3439, %v2025_v45   ;;  %v3112_v57 = vcombine.low %v1465_v47, %v1468_v28  ;;  %v1472_v12 = vsel %vm4107_vm7, %v3094_v22, %v1471_v17  ;;  %v1473_v43 = vrot.slane %v1471_v17, 4  ;;  %v1928_v51 = vmul.f32 72.0, %v3516_v18  ;;  %v5000_v18 = vld [vmem:[#allocation9_spill] sm:$0xff] }
  0xa5   : > { %v1479_v40 = vsel %vm4107_vm7, %v3095_v35, %v1478_v32  ;;  %v1480_v62 = vrot.slane %v1478_v32, 4  ;;  %v3061_v23 = vcombine.low %v3933_v56, %v3941_v59  ;;  %v3096_v49 = vrot.slane %v3972_v4, 9 }
  0xa6   : > { %3357 = vmatprep.mubr.msk.bf16.mxu0 %vm858_vm3, %v3112_v57  ;;  %v1475_v3 = vsel %vm4107_vm7, %v1473_v43, %v1474_v54  ;;  %v1485_v46 = vrot.slane %v3982_v33, 5  ;;  %v3518_v8 = vpop.eup %3517  ;;  %v2028_v38 = vmul.f32 %v4289_v37, %v1928_v51  ;;  %v1488_v25 = vrot.slane %v3987_v44, 5 }
  0xa7   : > { %v3113_v16 = vcombine.low %v1472_v12, %v1475_v3  ;;  %v1482_v52 = vsel %vm4107_vm7, %v1480_v62, %v1481_v63  ;;  %v3520_v15 = vpop.eup %3519  ;;  %v1926_v22 = vmul.f32 72.0, %v3518_v8  ;;  %v3097_v47 = vrot.slane %v4024_v1, 9  ;;  %v5001_v3 = vld [vmem:[#allocation8_spill] sm:$0xff] }
  0xa8   : > { %v3114_v13 = vcombine.low %v1479_v40, %v1482_v52  ;;  %v1487_v53 = vrot.slane %v1485_v46, 4  ;;  %2170 = vperm.xlu1 %3440, %v2028_v38   ;;  %v1930_v56 = vmul.f32 72.0, %v3520_v15  ;;  %v1492_v59 = vrot.slane %v4032_v11, 5 }
  0xa9   : > { %v1495_v45 = vrot.slane %v4999_v39, 5  ;;  %v3064_v0 = vcombine.low %v4065_v19, %v4074_v27  ;;  %v2027_v17 = vmul.f32 %v4319_v50, %v1926_v22  ;;  %3322 = vmatmul.mubr.msk.bf16.gmra.mxu1 %vm858_vm3, %v3060_v42  ;;  %v3098_v44 = vrot.slane %v4065_v19, 9 }
  0xaa   : > { %v1499_v41 = vrot.slane %v4074_v27, 5  ;;  %3325 = vmatprep.mubr.msk.bf16.mxu1 %vm858_vm3, %v3061_v23  ;;  %v1486_v54 = vsel %vm4107_vm7, %v3096_v49, %v1485_v46  ;;  %v1489_v28 = vsel %vm4107_vm7, %v1487_v53, %v1488_v25  ;;  %v1494_v35 = vrot.slane %v1492_v59, 4  ;;  %v5002_v23 = vld [vmem:[#allocation11_spill] sm:$0xff] }
  0xab   : > { %3358 = vmatmul.mubr.msk.bf16.gmra.mxu0 %vm858_vm3, %v3113_v16  ;;  %2165 = vperm.xlu0 %3439, %v2027_v17   ;;  %v2029_v32 = vmul.f32 %v4330_v5, %v1930_v56  ;;  %v1502_v63 = vrot.slane %v4078_v10, 5  ;;  %v1493_v57 = vsel %vm4107_vm7, %v3097_v47, %v1492_v59  ;;  %v3062_v43 = vcombine.low %v3972_v4, %v3982_v33  ;;  %v5003_v4 = vld [vmem:[#allocation13_spill] sm:$0xff]  ;;  %v5004_v33 = vld [vmem:[#allocation10_spill] sm:$0xff] }
  0xac   : > { %3361 = vmatprep.mubr.msk.bf16.mxu0 %vm858_vm3, %v3114_v13  ;;  %v1500_v19 = vsel %vm4107_vm7, %v3098_v44, %v1499_v41  ;;  %v1501_v27 = vrot.slane %v1499_v41, 4  ;;  %2266 = vperm.xlu1 %3440, %v5000_v18   ;;  %v1496_v12 = vsel %vm4107_vm7, %v1494_v35, %v1495_v45  ;;  %v3115_v42 = vcombine.low %v1486_v54, %v1489_v28 }
  0xad   : > { %v3063_v40 = vcombine.low %v4024_v1, %v4032_v11  ;;  %v3116_v10 = vcombine.low %v1493_v57, %v1496_v12  ;;  %v5005_v1 = vld [vmem:[#allocation12_spill] sm:$0xff]  ;;  %v5006_v11 = vld [vmem:[#allocation14_spill] sm:$0xff] }
  0xae   : > { %v1503_v51 = vsel %vm4107_vm7, %v1501_v27, %v1502_v63 }
  0xaf   : > { %v3117_v62 = vcombine.low %v1500_v19, %v1503_v51  ;;  %2175 = vperm.xlu0 %3439, %v2029_v32  }
  0xb0   : > { %2276 = vperm.xlu1 %3440, %v5001_v3  }
  0xb1   : > { %3326 = vmatmul.mubr.msk.bf16.gmra.mxu1 %vm858_vm3, %v3062_v43 }
  0xb2   : > { %3329 = vmatprep.mubr.msk.bf16.mxu1 %vm858_vm3, %v3063_v40 }
  0xb3   : > { %3362 = vmatmul.mubr.msk.bf16.gmra.mxu0 %vm858_vm3, %v3115_v42  ;;  %2271 = vperm.xlu0 %3439, %v5002_v23  }
  0xb4   : > { %3365 = vmatprep.mubr.msk.bf16.mxu0 %vm858_vm3, %v3116_v10  ;;  %2286 = vperm.xlu1 %3440, %v5003_v4  }
  0xb7   : > { %2281 = vperm.xlu0 %3439, %v5004_v33  }
  0xb8   : > { %2296 = vperm.xlu1 %3440, %v4015_v55   ;;  %v1838_v55 = vld [vmem:[%s3820_s13 + $0xe8] sm:$0xff] }
  0xb9   : > { %3330 = vmatmul.mubr.msk.bf16.gmra.mxu1 %vm858_vm3, %v3064_v0  ;;  %v1870_v49 = vadd.f32 1e-08, %v1838_v55 }
  0xbb   : > { %3366 = vmatmul.mubr.msk.bf16.gmra.mxu0 %vm858_vm3, %v3117_v62  ;;  %2291 = vperm.xlu0 %3439, %v5005_v1   ;;  %3521 = vrcp.f32 %v1870_v49 }
  0xbc   : > { %2306 = vperm.xlu1 %3440, %v4034_v14   ;;  %v1839_v14 = vld [vmem:[%s3820_s13 + $0xf0] sm:$0xff] }
  0xbd   : > { %v1871_v46 = vadd.f32 1e-08, %v1839_v14 }
  0xbf   : > { %2301 = vperm.xlu0 %3439, %v5006_v11   ;;  %3523 = vrcp.f32 %v1871_v46 }
  0xc0   : > { %2316 = vperm.xlu1 %3440, %v4115_v34   ;;  %v1840_v34 = vld [vmem:[%s3820_s13 + $0xf8] sm:$0xff]  ;;  %s2823_s13 = sshll.u32 %s318_s12, 4  ;;  %s4887_s13 = int_to_ptr.vmem [resolvable:$true] %s2823_s13 }
  0xc1   : > { %v1968_v8 = vmax.f32 %v1840_v34, 0.0  ;;  %s3538_s15 = scalar_lea.vmem %s4887_s13, 16 }
  0xc2   : > { %p3539_p12 = scmp.ne.s32.totalorder %s4887_s13, %s3538_s15 }
  0xc3   : > { %2311 = vperm.xlu0 %3439, %v5007_v20   ;;  %v2000_v52 = vmin.f32 %v1968_v8, 1.0 }
  0xc4   : > { %2326 = vperm.xlu1 %3440, %v4138_v2   ;;  %p3540_p13 = pnand %p3539_p12, %p3724_p4 }
  0xc6   : > { %p3541_p0 = pneg %p3540_p13 }
  0xc7   : > { %2321 = vperm.xlu0 %3439, %v4100_v9   ;;  %v1872_v9 = vadd.f32 1e-08, %v1840_v34 }
  0xc8   : > { %2336 = vperm.xlu1 %3440, %v4144_v6   ;;  %v3522_v2 = vpop.eup %3521 }
  0xc9   : > { %3525 = vrcp.f32 %v1872_v9 }
  0xcb   : > { %2331 = vperm.xlu0 %3439, %v4128_v26   ;;  %v1966_v26 = vmax.f32 %v1838_v55, 0.0 }
  0xcc   : > { %2346 = vperm.xlu1 %3440, %v4180_v48   ;;  %v4412_v48 = vpop.permute.xlu1 %2045 }
  0xcd   : > { %v1998_v6 = vmin.f32 %v1966_v26, 1.0 }
  0xcf   : > { %2341 = vperm.xlu0 %3439, %v4142_v58   ;;  %v1932_v58 = vmul.f32 72.0, %v3522_v2 }
  0xd0   : > { %2356 = vperm.xlu1 %3440, %v4231_v60   ;;  %v3524_v60 = vpop.eup %3523 }
  0xd3   : > { %2351 = vperm.xlu0 %3439, %v4177_v30   ;;  %v1967_v30 = vmax.f32 %v1839_v14, 0.0 }
  0xd4   : > { %2366 = vperm.xlu1 %3440, %v4235_v29   ;;  %v2030_v29 = vmul.f32 %v1998_v6, %v1932_v58 }
  0xd6   : > { %v3526_v38 = vpop.eup %3525 }
  0xd7   : > { %2361 = vperm.xlu0 %3439, %v4190_v31   ;;  %v4415_v31 = vpop.permute.xlu0 %2035  ;;  %v1936_v16 = vmul.f32 72.0, %v3526_v38 }
  0xd8   : > { %2376 = vperm.xlu1 %3440, %v4275_v24   ;;  %v1999_v24 = vmin.f32 %v1967_v30, 1.0 }
  0xdb   : > { %2371 = vperm.xlu0 %3439, %v4233_v21   ;;  %v1934_v21 = vmul.f32 72.0, %v3524_v60  ;;  %v4421_v25 = vpop.permute.xlu0 %2040 }
  0xdc   : > { %2386 = vperm.xlu1 %3440, %v4283_v7  }
  0xdd   : > { %v2031_v7 = vmul.f32 %v1999_v24, %v1934_v21 }
  0xdf   : > { %2381 = vperm.xlu0 %3439, %v4241_v61   ;;  %v4419_v61 = vpop.permute.xlu1 %2050  ;;  %v4426_v15 = vpop.permute.xlu0 %2055 }
  0xe0   : > { %2396 = vperm.xlu1 %3440, %v4319_v50   ;;  %v2032_v50 = vmul.f32 %v2000_v52, %v1936_v16 }
  0xe3   : > { %2391 = vperm.xlu0 %3439, %v4277_v36   ;;  %v4424_v36 = vpop.permute.xlu1 %2060 }
  0xe4   : > { %2401 = vperm.xlu1 %3440, %v4289_v37  }
  0xe7   : > { %2180 = vperm.xlu0 %3439, %v2030_v29   ;;  %v4428_v37 = vpop.permute.xlu1 %2070 }
  0xe8   : > { %2406 = vperm.xlu1 %3440, %v4330_v5   ;;  %v4430_v22 = vpop.permute.xlu0 %2065 }
  0xeb   : > { %2185 = vperm.xlu0 %3439, %v2031_v7   ;;  %v4432_v13 = vpop.permute.xlu1 %2080 }
  0xec   : > { %2411 = vperm.xlu1 %3440, %v1998_v6   ;;  %v4434_v53 = vpop.permute.xlu0 %2075 }
  0xef   : > { %2190 = vperm.xlu0 %3439, %v2032_v50  }
  0xf0   : > { %2421 = vperm.xlu1 %3440, %v2000_v52  }
  0xf1   : > { %v3267_v56 = vpop.f32.mrf.mxu0 }
  0xf3   : > { %2416 = vperm.xlu0 %3439, %v1999_v24   ;;  %v945_v45 = vpop.f32.mrf.mxu0 }
  0xf5   : > { %v4450_v41 = vpop.f32.mrf.mxu0 }
  0xf6   : > { %v4446_v17 = vpop.f32.mrf.mxu1 }
  0xf7   : > { %v4456_v35 = vpop.f32.mrf.mxu0 }
  0xf8   : > { %v4454_v28 = vpop.f32.mrf.mxu1 }
  0xfa   : > { %v4462_v27 = vpop.f32.mrf.mxu1 }
  0xfc   : > { %v4468_v57 = vpop.f32.mrf.mxu1 }
  0xfd   : > { %v4436_v47 = vpop.permute.xlu1 %2090 }
  0xff   : > { %v4438_v5 = vpop.permute.xlu0 %2085 }
 0x101   : > { %v4440_v59 = vpop.permute.xlu1 %2100 }
 0x103   : > { %v4442_v39 = vpop.permute.xlu0 %2095 }
 0x105   : > { %v4448_v44 = vpop.permute.xlu1 %2110  ;;  %v4464_v63 = vpop.f32.mrf.mxu0 }
 0x107   : > { %v4444_v0 = vpop.permute.xlu0 %2105  ;;  %v4472_v43 = vpop.f32.mrf.mxu0 }
 0x109   : > { %v4458_v32 = vpop.permute.xlu1 %2120  ;;  %v4476_v42 = vpop.f32.mrf.mxu0 }
 0x10a   : > { %5008 = vst [vmem:[#allocation16_spill] sm:$0xff] %v4458_v32  ;;  %v4474_v51 = vpop.f32.mrf.mxu1 }
 0x10b   : > { %v4452_v54 = vpop.permute.xlu0 %2115  ;;  %5011 = vst [vmem:[#allocation11_spill] sm:$0xff] %v4474_v51  ;;  %v4484_v3 = vpop.f32.mrf.mxu0 }
 0x10c   : > { %v4482_v10 = vpop.f32.mrf.mxu1 }
 0x10d   : > { %5014 = vst [vmem:[#allocation12_spill] sm:$0xff] %v4482_v10 }
 0x10e   : > { %v4488_v4 = vpop.f32.mrf.mxu1 }
 0x10f   : > { %v4470_v12 = vpop.permute.xlu1 %2130  ;;  %5016 = vst [vmem:[#allocation15_spill] sm:$0xff] %v4488_v4 }
 0x110   : > { %v4460_v19 = vpop.permute.xlu0 %2125  ;;  %5010 = vst [vmem:[#allocation8_spill] sm:$0xff] %v4470_v12  ;;  %v4494_v11 = vpop.f32.mrf.mxu1 }
 0x111   : > { %5018 = vst [vmem:[#allocation18_spill] sm:$0xff] %v4494_v11 }
 0x113   : > { %v4480_v62 = vpop.permute.xlu1 %2140 }
 0x114   : > { %v4466_v18 = vpop.permute.xlu0 %2135  ;;  %5013 = vst [vmem:[#allocation10_spill] sm:$0xff] %v4480_v62 }
 0x115   : > { %5009 = vst [vmem:[#allocation9_spill] sm:$0xff] %v4466_v18 }
 0x119   : > { %v4490_v33 = vpop.permute.xlu1 %2150 }
 0x11a   : > { %5017 = vst [vmem:[#allocation17_spill] sm:$0xff] %v4490_v33  ;;  %v4492_v1 = vpop.f32.mrf.mxu0 }
 0x11b   : > { %v4478_v40 = vpop.permute.xlu0 %2145 }
 0x11c   : > { %5012 = vst [vmem:[#allocation13_spill] sm:$0xff] %v4478_v40  ;;  %v4496_v20 = vpop.f32.mrf.mxu0 }
 0x11d   : > { %v4500_v49 = vpop.permute.xlu1 %2160 }
 0x11e   : > { %5020 = vst [vmem:[#allocation20_spill] sm:$0xff] %v4500_v49  ;;  %v4504_v46 = vpop.f32.mrf.mxu0 }
 0x11f   : > { %v4486_v23 = vpop.permute.xlu0 %2155 }
 0x120   : > { %5015 = vst [vmem:[#allocation14_spill] sm:$0xff] %v4486_v23  ;;  %v4512_v2 = vpop.f32.mrf.mxu0 }
 0x121   : > { %v4502_v14 = vpop.f32.mrf.mxu1 }
 0x122   : > { %5021 = vst [vmem:[#allocation21_spill] sm:$0xff] %v4502_v14 }
 0x123   : > { %v4508_v9 = vpop.f32.mrf.mxu1  ;;  %v4510_v26 = vpop.permute.xlu1 %2170 }
 0x124   : > { %5023 = vst [vmem:[#allocation23_spill] sm:$0xff] %v4508_v9  ;;  %5024 = vst [vmem:[#allocation24_spill] sm:$0xff] %v4510_v26 }
 0x125   : > { %v4514_v58 = vpop.f32.mrf.mxu1 }
 0x126   : > { %v4498_v55 = vpop.permute.xlu0 %2165  ;;  %5025 = vst [vmem:[#allocation25_spill] sm:$0xff] %v4514_v58 }
 0x127   : > { %5019 = vst [vmem:[#allocation19_spill] sm:$0xff] %v4498_v55  ;;  %v2267_v60 = vpop.permute.xlu1 %2266  ;;  %v4522_v21 = vpop.f32.mrf.mxu1 }
 0x128   : > { %5026 = vst [vmem:[#allocation26_spill] sm:$0xff] %v4522_v21 }
 0x12a   : > { %v4506_v34 = vpop.permute.xlu0 %2175 }
 0x12b   : > { %5022 = vst [vmem:[#allocation22_spill] sm:$0xff] %v4506_v34  ;;  %v2277_v7 = vpop.permute.xlu1 %2276 }
 0x12e   : > { %v4516_v6 = vpop.permute.xlu0 %2271 }
 0x12f   : > { %v4538_v23 = vpop.permute.xlu1 %2286 }
 0x131   : > { %v4518_v30 = vpop.f32.mrf.mxu0 }
 0x132   : > { %v2282_v8 = vpop.permute.xlu0 %2281 }
 0x133   : > { %v4520_v29 = vpop.f32.mrf.mxu0 }
 0x135   : > { %v4524_v24 = vpop.f32.mrf.mxu0 }
 0x136   : > { %v4534_v34 = vpop.permute.xlu0 %2291 }
 0x137   : > { %v4528_v16 = vpop.f32.mrf.mxu0 }
 0x138   : > { %v4526_v38 = vpop.f32.mrf.mxu1 }
 0x139   : > { %5027 = vst [vmem:[#allocation27_spill] sm:$0xff] %v4526_v38 }
 0x13a   : > { %v4530_v52 = vpop.f32.mrf.mxu1  ;;  %v4540_v33 = vpop.permute.xlu0 %2301 }
 0x13b   : > { %5028 = vst [vmem:[#allocation28_spill] sm:$0xff] %v4530_v52 }
 0x13c   : > { %v4532_v50 = vpop.f32.mrf.mxu1 }
 0x13d   : > { %5029 = vst [vmem:[#allocation29_spill] sm:$0xff] %v4532_v50  ;;  %v4545_v50 = vld [vmem:[%s4967_s3] ss:$0 sm:$0xff] }
 0x13e   : > { %v4536_v26 = vpop.f32.mrf.mxu1  ;;  %v4555_v10 = vpop.permute.xlu0 %2311 }
 0x13f   : > { %v3339_v49 = vpop.f32.mrf.mxu0  ;;  %5030 = vst [vmem:[#allocation30_spill] sm:$0xff] %v4536_v26  ;;  %v4547_v26 = vpop.permute.xlu1 %2296 }
 0x140   : > { %v3303_v58 = vpop.f32.mrf.mxu1 }
 0x141   : > { %v1650_v21 = vpop.f32.mrf.mxu0  ;;  %v1255_v55 = vadd.f32 %v3303_v58, %v3267_v56 }
 0x142   : > { %v1246_v38 = vpop.f32.mrf.mxu1 }
 0x143   : > { %v3340_v62 = vpop.f32.mrf.mxu0  ;;  %v1779_v9 = vadd.f32 %v3339_v49, %v1255_v55  ;;  %v1247_v14 = vadd.f32 %v1246_v38, %v945_v45 }
 0x144   : > { %v3304_v11 = vpop.f32.mrf.mxu1 }
 0x145   : > { %v1653_v52 = vpop.f32.mrf.mxu0  ;;  %v2195_v4 = vmul.f32 %v4412_v48, %v1779_v9  ;;  %v1777_v18 = vadd.f32 %v1650_v21, %v1247_v14  ;;  %v1258_v56 = vadd.f32 %v3304_v11, %v4450_v41 }
 0x146   : > { %v1249_v58 = vpop.f32.mrf.mxu1 }
 0x147   : > { %v2234_v40 = vadd.f32 %v4545_v50, %v2195_v4  ;;  %v2193_v45 = vmul.f32 %v4415_v31, %v1777_v18  ;;  %v1780_v55 = vadd.f32 %v3340_v62, %v1258_v56  ;;  %v1250_v49 = vadd.f32 %v1249_v58, %v4456_v35  ;;  %v3343_v38 = vpop.f32.mrf.mxu0  ;;  %v4565_v18 = vpop.permute.xlu1 %2306 }
 0x148   : > { %v3307_v32 = vpop.f32.mrf.mxu1 }
 0x149   : > { %v2426_v12 = vmul.f32 %v2277_v7, %v2234_v40  ;;  %v2232_v51 = vadd.f32 %v4545_v50, %v2193_v45  ;;  %v2196_v48 = vmul.f32 %v4419_v61, %v1780_v55  ;;  %v1778_v14 = vadd.f32 %v1653_v52, %v1250_v49  ;;  %v1666_v41 = vpop.f32.mrf.mxu0  ;;  %v4574_v49 = vpop.permute.xlu0 %2321 }
 0x14a   : > { %v1271_v31 = vadd.f32 %v3307_v32, %v4464_v63  ;;  %v1262_v35 = vpop.f32.mrf.mxu1 }
 0x14b   : > { %v2530_v40 = vmul.f32 %v2426_v12, %v2426_v12  ;;  %v3177_v62 = vpack.c.bf16 %v2426_v12, %v2426_v12  ;;  %v2424_v4 = vmul.f32 %v2267_v60, %v2232_v51  ;;  %v3344_v11 = vpop.f32.mrf.mxu0  ;;  %v2235_v61 = vadd.f32 %v4545_v50, %v2196_v48 }
 0x14c   : > { %v2194_v9 = vmul.f32 %v4421_v25, %v1778_v14  ;;  %v1783_v21 = vadd.f32 %v3343_v38, %v1271_v31  ;;  %v1263_v7 = vadd.f32 %v1262_v35, %v4472_v43  ;;  %v3308_v52 = vpop.f32.mrf.mxu1  ;;  %v2460_v25 = vsel %vm2456_vm9, %v2426_v12, 0.0 }
 0x14d   : > { %2761 = vst.msk [vmem:[%s4562_s30 + $0x8] sm:$0xf] %vm2758_vm8, %v3177_v62  ;;  %v2528_v32 = vmul.f32 %v2424_v4, %v2424_v4  ;;  %v3175_v63 = vpack.c.bf16 %v2424_v4, %v2424_v4  ;;  %v1669_v56 = vpop.f32.mrf.mxu0  ;;  %v2427_v58 = vmul.f32 %v2282_v8, %v2235_v61  ;;  %v2563_v38 = vsel %vm2456_vm9, %v2530_v40, 0.0  ;;  %v4584_v62 = vpop.permute.xlu1 %2316 }
 0x14e   : > { %v2233_v45 = vadd.f32 %v4545_v50, %v2194_v9  ;;  %v2199_v51 = vmul.f32 %v4430_v22, %v1783_v21  ;;  %v1781_v60 = vadd.f32 %v1666_v41, %v1263_v7  ;;  %v1265_v55 = vpop.f32.mrf.mxu1  ;;  %v1274_v43 = vadd.f32 %v3308_v52, %v4476_v42 }
 0x14f   : > { %2759 = vst.msk [vmem:[%s4562_s30] sm:$0xf] %vm2758_vm8, %v3175_v63  ;;  %v1266_v48 = vadd.f32 %v1265_v55, %v4484_v3  ;;  %v2457_v14 = vsel %vm2456_vm9, %v2424_v4, 0.0  ;;  %v2531_v31 = vmul.f32 %v2427_v58, %v2427_v58  ;;  %v3178_v22 = vpack.c.bf16 %v2427_v58, %v2427_v58 }
 0x150   : > { %v3347_v8 = vpop.f32.mrf.mxu0  ;;  %v2425_v41 = vmul.f32 %v4516_v6, %v2233_v45  ;;  %v2238_v12 = vadd.f32 %v4545_v50, %v2199_v51  ;;  %v2197_v40 = vmul.f32 %v4426_v15, %v1781_v60  ;;  %v1784_v61 = vadd.f32 %v3344_v11, %v1274_v43  ;;  %v4603_v43 = vpop.permute.xlu0 %2331 }
 0x151   : > { %v3311_v35 = vpop.f32.mrf.mxu1  ;;  %v1782_v9 = vadd.f32 %v1669_v56, %v1266_v48  ;;  %v2560_v3 = vsel %vm2456_vm9, %v2528_v32, 0.0  ;;  %2762 = vst.msk [vmem:[%s4562_s30 + $0xc] sm:$0xf] %vm2758_vm8, %v3178_v22  ;;  %v2462_v56 = vsel %vm2456_vm9, %v2427_v58, 0.0 }
 0x152   : > { %v1682_v42 = vpop.f32.mrf.mxu0  ;;  %v2458_v4 = vsel %vm2456_vm9, %v2425_v41, 0.0  ;;  %v2529_v21 = vmul.f32 %v2425_v41, %v2425_v41  ;;  %v3176_v7 = vpack.c.bf16 %v2425_v41, %v2425_v41  ;;  %v2430_v63 = vmul.f32 %v4547_v26, %v2238_v12 }
 0x153   : > { %v1278_v6 = vpop.f32.mrf.mxu1  ;;  %v2459_v52 = vadd.f32 %v2458_v4, %v2457_v14  ;;  %v2236_v45 = vadd.f32 %v4545_v50, %v2197_v40  ;;  %v2200_v15 = vmul.f32 %v4428_v37, %v1784_v61  ;;  %v2198_v51 = vmul.f32 %v4424_v36, %v1782_v9  ;;  %v4609_v61 = vpop.permute.xlu1 %2326 }
 0x154   : > { %v4595_v11 = vpop.f32.mrf.mxu0  ;;  %v2561_v32 = vsel %vm2456_vm9, %v2529_v21, 0.0  ;;  %2760 = vst.msk [vmem:[%s4562_s30 + $0x4] sm:$0xf] %vm2758_vm8, %v3176_v7  ;;  %v1287_v60 = vadd.f32 %v3311_v35, %v4492_v1  ;;  %v2565_v26 = vsel %vm2456_vm9, %v2531_v31, 0.0  ;;  %v2534_v14 = vmul.f32 %v2430_v63, %v2430_v63 }
 0x155   : > { %v3312_v55 = vpop.f32.mrf.mxu1  ;;  %v2461_v48 = vadd.f32 %v2460_v25, %v2459_v52  ;;  %v2562_v37 = vadd.f32 %v2561_v32, %v2560_v3  ;;  %v3181_v22 = vpack.c.bf16 %v2430_v63, %v2430_v63  ;;  %v2428_v58 = vmul.f32 %v4538_v23, %v2236_v45 }
 0x156   : > { %v2239_v41 = vadd.f32 %v4545_v50, %v2200_v15  ;;  %v2237_v12 = vadd.f32 %v4545_v50, %v2198_v51  ;;  %v1685_v36 = vpop.f32.mrf.mxu0  ;;  %v1787_v9 = vadd.f32 %v3347_v8, %v1287_v60  ;;  %v1279_v31 = vadd.f32 %v1278_v6, %v4496_v20 }
 0x157   : > { %v1281_v40 = vpop.f32.mrf.mxu1  ;;  %v2564_v1 = vadd.f32 %v2563_v38, %v2562_v37  ;;  %v2463_v35 = vadd.f32 %v2462_v56, %v2461_v48  ;;  %2765 = vst.msk [vmem:[%s4562_s30 + $0x18] sm:$0xf] %vm2758_vm8, %v3181_v22  ;;  %v2464_v25 = vsel %vm2456_vm9, %v2428_v58, 0.0  ;;  %v2532_v3 = vmul.f32 %v2428_v58, %v2428_v58  ;;  %v2337_v22 = vpop.permute.xlu1 %2336 }
 0x158   : > { %v3179_v23 = vpack.c.bf16 %v2428_v58, %v2428_v58  ;;  %v2431_v4 = vmul.f32 %v4540_v33, %v2239_v41  ;;  %v2429_v52 = vmul.f32 %v4534_v34, %v2237_v12  ;;  %v2203_v38 = vmul.f32 %v4438_v5, %v1787_v9  ;;  %v4623_v33 = vpop.permute.xlu0 %2341 }
 0x159   : > { %v2465_v21 = vadd.f32 %v2464_v25, %v2463_v35  ;;  %v2566_v7 = vadd.f32 %v2565_v26, %v2564_v1  ;;  %v3315_v45 = vpop.f32.mrf.mxu1  ;;  %v2468_v8 = vsel %vm2456_vm9, %v2430_v63, 0.0  ;;  %v2571_v20 = vsel %vm2456_vm9, %v2534_v14, 0.0 }
 0x15a   : > { %v2567_v6 = vsel %vm2456_vm9, %v2532_v3, 0.0  ;;  %2763 = vst.msk [vmem:[%s4562_s30 + $0x10] sm:$0xf] %vm2758_vm8, %v3179_v23  ;;  %v3182_v15 = vpack.c.bf16 %v2431_v4, %v2431_v4  ;;  %v3351_v56 = vpop.f32.mrf.mxu0  ;;  %v2466_v34 = vsel %vm2456_vm9, %v2429_v52, 0.0  ;;  %v2533_v51 = vmul.f32 %v2429_v52, %v2429_v52 }
 0x15b   : > { %v2568_v32 = vadd.f32 %v2567_v6, %v2566_v7  ;;  %v3180_v60 = vpack.c.bf16 %v2429_v52, %v2429_v52  ;;  %v1294_v5 = vpop.f32.mrf.mxu1  ;;  %v2535_v26 = vmul.f32 %v2431_v4, %v2431_v4  ;;  %v2467_v63 = vadd.f32 %v2466_v34, %v2465_v21 }
 0x15c   : > { %2766 = vst.msk [vmem:[%s4562_s30 + $0x1c] sm:$0xf] %vm2758_vm8, %v3182_v15  ;;  %v2242_v48 = vadd.f32 %v4545_v50, %v2203_v38  ;;  %v1785_v37 = vadd.f32 %v1682_v42, %v1279_v31  ;;  %v1698_v14 = vpop.f32.mrf.mxu0  ;;  %v2569_v58 = vsel %vm2456_vm9, %v2533_v51, 0.0  ;;  %v1290_v41 = vadd.f32 %v3312_v55, %v4504_v46  ;;  %v4641_v52 = vpop.permute.xlu0 %2351 }
 0x15d   : > { %2764 = vst.msk [vmem:[%s4562_s30 + $0x14] sm:$0xf] %vm2758_vm8, %v3180_v60  ;;  %v1282_v12 = vadd.f32 %v1281_v40, %v4512_v2  ;;  %v1303_v1 = vadd.f32 %v3315_v45, %v4518_v30  ;;  %v3316_v35 = vpop.f32.mrf.mxu1  ;;  %v2469_v9 = vadd.f32 %v2468_v8, %v2467_v63  ;;  %v2570_v25 = vadd.f32 %v2569_v58, %v2568_v32  ;;  %v4651_v15 = vpop.permute.xlu1 %2346 }
 0x15e   : > { %v2434_v3 = vmul.f32 %v4584_v62, %v2242_v48  ;;  %v2201_v23 = vmul.f32 %v4434_v53, %v1785_v37  ;;  %v4637_v42 = vpop.f32.mrf.mxu0  ;;  %v1788_v31 = vadd.f32 %v4595_v11, %v1290_v41  ;;  %v1295_v46 = vadd.f32 %v1294_v5, %v4520_v29 }
 0x15f   : > { %v1786_v21 = vadd.f32 %v1685_v36, %v1282_v12  ;;  %v1791_v7 = vadd.f32 %v3351_v56, %v1303_v1  ;;  %v1297_v55 = vpop.f32.mrf.mxu1  ;;  %v2572_v2 = vadd.f32 %v2571_v20, %v2570_v25  ;;  %v2470_v38 = vsel %vm2456_vm9, %v2431_v4, 0.0 }
 0x160   : > { %v3185_v40 = vpack.c.bf16 %v2434_v3, %v2434_v3  ;;  %v1701_v30 = vpop.f32.mrf.mxu0  ;;  %v2240_v62 = vadd.f32 %v4545_v50, %v2201_v23  ;;  %v2204_v53 = vmul.f32 %v4436_v47, %v1788_v31  ;;  %v2573_v11 = vsel %vm2456_vm9, %v2535_v26, 0.0 }
 0x161   : > { %v2202_v45 = vmul.f32 %v4432_v13, %v1786_v21  ;;  %v3319_v8 = vpop.f32.mrf.mxu1  ;;  %v2471_v29 = vadd.f32 %v2470_v38, %v2469_v9  ;;  %v2207_v36 = vmul.f32 %v4444_v0, %v1791_v7  ;;  %v1789_v20 = vadd.f32 %v1698_v14, %v1295_v46  ;;  %v2357_v7 = vpop.permute.xlu1 %2356 }
 0x162   : > { %2769 = vst.msk [vmem:[%s4562_s30 + $0x28] sm:$0xf] %vm2758_vm8, %v3185_v40  ;;  %v2538_v56 = vmul.f32 %v2434_v3, %v2434_v3  ;;  %v2432_v4 = vmul.f32 %v4565_v18, %v2240_v62  ;;  %v2243_v32 = vadd.f32 %v4545_v50, %v2204_v53  ;;  %v2574_v34 = vadd.f32 %v2573_v11, %v2572_v2 }
 0x163   : > { %v3355_v6 = vpop.f32.mrf.mxu0  ;;  %v2241_v47 = vadd.f32 %v4545_v50, %v2202_v45  ;;  %v1310_v13 = vpop.f32.mrf.mxu1  ;;  %v2246_v51 = vadd.f32 %v4545_v50, %v2207_v36  ;;  %v2205_v60 = vmul.f32 %v4442_v39, %v1789_v20  ;;  %v1306_v0 = vadd.f32 %v3316_v35, %v4524_v24 }
 0x164   : > { %v2472_v26 = vsel %vm2456_vm9, %v2432_v4, 0.0  ;;  %v2536_v63 = vmul.f32 %v2432_v4, %v2432_v4  ;;  %v3183_v48 = vpack.c.bf16 %v2432_v4, %v2432_v4  ;;  %v2435_v18 = vmul.f32 %v4574_v49, %v2243_v32  ;;  %v4667_v39 = vpop.permute.xlu0 %2361 }
 0x165   : > { %v4659_v5 = vpop.f32.mrf.mxu0  ;;  %v3320_v37 = vpop.f32.mrf.mxu1  ;;  %v2473_v14 = vadd.f32 %v2472_v26, %v2471_v29  ;;  %v2433_v58 = vmul.f32 %v4555_v10, %v2241_v47  ;;  %v4664_v41 = vmul.f32 %v2337_v22, %v2246_v51  ;;  %v2244_v12 = vadd.f32 %v4545_v50, %v2205_v60 }
 0x166   : > { %v2575_v24 = vsel %vm2456_vm9, %v2536_v63, 0.0  ;;  %2767 = vst.msk [vmem:[%s4562_s30 + $0x20] sm:$0xf] %vm2758_vm8, %v3183_v48  ;;  %v2539_v35 = vmul.f32 %v2435_v18, %v2435_v18  ;;  %v3186_v9 = vpack.c.bf16 %v2435_v18, %v2435_v18  ;;  %v1298_v49 = vadd.f32 %v1297_v55, %v4528_v16 }
 0x167   : > { %v3356_v1 = vpop.f32.mrf.mxu0  ;;  %v1313_v25 = vpop.f32.mrf.mxu1  ;;  %v2576_v23 = vadd.f32 %v2575_v24, %v2574_v34  ;;  %v2474_v10 = vsel %vm2456_vm9, %v2433_v58, 0.0  ;;  %v2537_v22 = vmul.f32 %v2433_v58, %v2433_v58  ;;  %v3184_v31 = vpack.c.bf16 %v2433_v58, %v2433_v58 }
 0x168   : > { %v2476_v46 = vsel %vm2456_vm9, %v2434_v3, 0.0  ;;  %v2579_v2 = vsel %vm2456_vm9, %v2538_v56, 0.0  ;;  %2770 = vst.msk [vmem:[%s4562_s30 + $0x2c] sm:$0xf] %vm2758_vm8, %v3186_v9  ;;  %v2475_v40 = vadd.f32 %v2474_v10, %v2473_v14  ;;  %v1319_v38 = vadd.f32 %v3319_v8, %v4446_v17 }
 0x169   : > { %v4674_v21 = vpop.f32.mrf.mxu0  ;;  %v3323_v16 = vpop.f32.mrf.mxu1  ;;  %v2577_v55 = vsel %vm2456_vm9, %v2537_v22, 0.0  ;;  %2768 = vst.msk [vmem:[%s4562_s30 + $0x24] sm:$0xf] %vm2758_vm8, %v3184_v31  ;;  %v3189_v62 = vpack.c.bf16 %v4664_v41, %v4664_v41  ;;  %v2436_v53 = vmul.f32 %v4609_v61, %v2244_v12  ;;  %v1792_v3 = vadd.f32 %v4637_v42, %v1306_v0  ;;  %v5031_v22 = vld [vmem:[#allocation11_spill] sm:$0xff] }
 0x16a   : > { %v2478_v11 = vsel %vm2456_vm9, %v2435_v18, 0.0  ;;  %v2477_v29 = vadd.f32 %v2476_v46, %v2475_v40  ;;  %v2578_v36 = vadd.f32 %v2577_v55, %v2576_v23  ;;  %v1790_v17 = vadd.f32 %v1701_v30, %v1298_v49  ;;  %v4699_v42 = vpop.permute.xlu0 %2371  ;;  %v4712_v18 = vpop.permute.xlu1 %2366 }
 0x16b   : > { %v4688_v45 = vpop.f32.mrf.mxu0  ;;  %v4691_v8 = vpop.f32.mrf.mxu1  ;;  %v2581_v20 = vsel %vm2456_vm9, %v2539_v35, 0.0  ;;  %2773 = vst.msk [vmem:[%s4562_s30 + $0x38] sm:$0xf] %vm2758_vm8, %v3189_v62  ;;  %v2540_v56 = vmul.f32 %v2436_v53, %v2436_v53  ;;  %v3187_v4 = vpack.c.bf16 %v2436_v53, %v2436_v53  ;;  %v2208_v61 = vmul.f32 %v4448_v44, %v1792_v3 }
 0x16c   : > { %v2580_v47 = vadd.f32 %v2579_v2, %v2578_v36  ;;  %v2479_v34 = vadd.f32 %v2478_v11, %v2477_v29  ;;  %v2206_v51 = vmul.f32 %v4440_v59, %v1790_v17  ;;  %v1795_v60 = vadd.f32 %v3355_v6, %v1319_v38 }
 0x16d   : > { %v4697_v32 = vpop.f32.mrf.mxu0  ;;  %v4702_v30 = vpop.f32.mrf.mxu1  ;;  %v2480_v0 = vsel %vm2456_vm9, %v2436_v53, 0.0  ;;  %2771 = vst.msk [vmem:[%s4562_s30 + $0x30] sm:$0xf] %vm2758_vm8, %v3187_v4  ;;  %v2247_v26 = vadd.f32 %v4545_v50, %v2208_v61  ;;  %v1311_v63 = vadd.f32 %v1310_v13, %v4454_v28  ;;  %v1322_v44 = vadd.f32 %v3320_v37, %v4462_v27 }
 0x16e   : > { %v2481_v14 = vadd.f32 %v2480_v0, %v2479_v34  ;;  %v2582_v58 = vadd.f32 %v2581_v20, %v2580_v47  ;;  %v2245_v59 = vadd.f32 %v4545_v50, %v2206_v51  ;;  %v2211_v6 = vmul.f32 %v4460_v19, %v1795_v60  ;;  %v5033_v47 = vld [vmem:[#allocation12_spill] sm:$0xff] }
 0x16f   : > { %v4710_v48 = vpop.f32.mrf.mxu0  ;;  %v4716_v12 = vpop.f32.mrf.mxu1  ;;  %v2583_v24 = vsel %vm2456_vm9, %v2540_v56, 0.0  ;;  %v2439_v35 = vmul.f32 %v4623_v33, %v2247_v26  ;;  %v1793_v28 = vadd.f32 %v4659_v5, %v1311_v63  ;;  %v1796_v13 = vadd.f32 %v3356_v1, %v1322_v44 }
 0x170   : > { %v2542_v27 = vmul.f32 %v4664_v41, %v4664_v41  ;;  %v2584_v37 = vadd.f32 %v2583_v24, %v2582_v58  ;;  %v2437_v9 = vmul.f32 %v4603_v43, %v2245_v59  ;;  %v2250_v49 = vadd.f32 %v4545_v50, %v2211_v6  ;;  %v4730_v1 = vpop.permute.xlu0 %2381  ;;  %v5035_v59 = vld [vmem:[#allocation13_spill] sm:$0xff] }
 0x171   : > { %v3190_v23 = vpack.c.bf16 %v2439_v35, %v2439_v35  ;;  %v2209_v19 = vmul.f32 %v4452_v54, %v1793_v28  ;;  %v1314_v10 = vadd.f32 %v1313_v25, %v4468_v57  ;;  %v1335_v31 = vadd.f32 %v3323_v16, %v5031_v22  ;;  %v4728_v33 = vpop.f32.mrf.mxu0  ;;  %v3327_v5 = vpop.f32.mrf.mxu1  ;;  %v5032_v57 = vld [vmem:[#allocation8_spill] sm:$0xff]  ;;  %v5037_v22 = vld [vmem:[#allocation15_spill] sm:$0xff] }
 0x172   : > { %v2482_v46 = vsel %vm2456_vm9, %v2437_v9, 0.0  ;;  %v2541_v2 = vmul.f32 %v2437_v9, %v2437_v9  ;;  %v3188_v40 = vpack.c.bf16 %v2437_v9, %v2437_v9  ;;  %v2442_v43 = vmul.f32 %v2357_v7, %v2250_v49  ;;  %v2377_v16 = vpop.permute.xlu1 %2376 }
 0x173   : > { %v2543_v38 = vmul.f32 %v2439_v35, %v2439_v35  ;;  %2774 = vst.msk [vmem:[%s4562_s30 + $0x3c] sm:$0xf] %vm2758_vm8, %v3190_v23  ;;  %v2483_v55 = vadd.f32 %v2482_v46, %v2481_v14  ;;  %v2248_v54 = vadd.f32 %v4545_v50, %v2209_v19  ;;  %v2212_v25 = vmul.f32 %v5032_v57, %v1796_v13  ;;  %v3363_v20 = vpop.f32.mrf.mxu0  ;;  %v1342_v56 = vpop.f32.mrf.mxu1  ;;  %v5034_v14 = vld [vmem:[#allocation16_spill] sm:$0xff]  ;;  %v5036_v19 = vld [vmem:[#allocation9_spill] sm:$0xff] }
 0x174   : > { %v2484_v62 = vsel %vm2456_vm9, %v4664_v41, 0.0  ;;  %v2587_v53 = vsel %vm2456_vm9, %v2542_v27, 0.0  ;;  %v2585_v3 = vsel %vm2456_vm9, %v2541_v2, 0.0  ;;  %2772 = vst.msk [vmem:[%s4562_s30 + $0x34] sm:$0xf] %vm2758_vm8, %v3188_v40  ;;  %v3193_v7 = vpack.c.bf16 %v2442_v43, %v2442_v43  ;;  %v4753_v26 = vpop.permute.xlu0 %2391  ;;  %v5038_v40 = vld [vmem:[#allocation18_spill] sm:$0xff] }
 0x175   : > { %v2485_v11 = vadd.f32 %v2484_v62, %v2483_v55  ;;  %v2586_v29 = vadd.f32 %v2585_v3, %v2584_v37  ;;  %v2440_v36 = vmul.f32 %v4651_v15, %v2248_v54  ;;  %v2251_v17 = vadd.f32 %v4545_v50, %v2212_v25  ;;  %v3328_v28 = vpop.f32.mrf.mxu1  ;;  %v5039_v57 = vld [vmem:[#allocation21_spill] sm:$0xff] }
 0x176   : > { %v2486_v4 = vsel %vm2456_vm9, %v2439_v35, 0.0  ;;  %2777 = vst.msk [vmem:[%s4562_s30 + $0x48] sm:$0xf] %vm2758_vm8, %v3193_v7  ;;  %v1794_v41 = vadd.f32 %v4674_v21, %v1314_v10  ;;  %v1799_v61 = vadd.f32 %v4688_v45, %v1335_v31  ;;  %v1327_v34 = vadd.f32 %v4691_v8, %v5033_v47  ;;  %v1746_v35 = vpop.f32.mrf.mxu0  ;;  %v4761_v13 = vpop.permute.xlu1 %2386  ;;  %v5042_v47 = vld [vmem:[#allocation10_spill] sm:$0xff] }
 0x177   : > { %v2589_v51 = vsel %vm2456_vm9, %v2543_v38, 0.0  ;;  %v2588_v60 = vadd.f32 %v2587_v53, %v2586_v29  ;;  %v2487_v0 = vadd.f32 %v2486_v4, %v2485_v11  ;;  %v2544_v15 = vmul.f32 %v2440_v36, %v2440_v36  ;;  %v1345_v53 = vpop.f32.mrf.mxu1 }
 0x178   : > { %v3191_v63 = vpack.c.bf16 %v2440_v36, %v2440_v36  ;;  %v2443_v44 = vmul.f32 %v4667_v39, %v2251_v17  ;;  %v2210_v58 = vmul.f32 %v5034_v14, %v1794_v41  ;;  %v2215_v21 = vmul.f32 %v5035_v59, %v1799_v61  ;;  %v3364_v62 = vpop.f32.mrf.mxu0  ;;  %v5041_v41 = vld [vmem:[#allocation17_spill] sm:$0xff] }
 0x179   : > { %v2492_v45 = vsel %vm2456_vm9, %v2442_v43, 0.0  ;;  %v2488_v6 = vsel %vm2456_vm9, %v2440_v36, 0.0  ;;  %v2590_v8 = vadd.f32 %v2589_v51, %v2588_v60  ;;  %v1797_v24 = vadd.f32 %v4697_v32, %v1327_v34  ;;  %v5040_v36 = vld [vmem:[#allocation23_spill] sm:$0xff] }
 0x17a   : > { %v2546_v27 = vmul.f32 %v2442_v43, %v2442_v43  ;;  %v2489_v37 = vadd.f32 %v2488_v6, %v2487_v0  ;;  %2775 = vst.msk [vmem:[%s4562_s30 + $0x40] sm:$0xf] %vm2758_vm8, %v3191_v63  ;;  %v3194_v39 = vpack.c.bf16 %v2443_v44, %v2443_v44  ;;  %v2249_v9 = vadd.f32 %v4545_v50, %v2210_v58 }
 0x17b   : > { %v2591_v49 = vsel %vm2456_vm9, %v2544_v15, 0.0  ;;  %v2254_v23 = vadd.f32 %v4545_v50, %v2215_v21  ;;  %v2213_v10 = vmul.f32 %v5036_v19, %v1797_v24  ;;  %v1338_v32 = vadd.f32 %v4702_v30, %v5037_v22  ;;  %v4779_v30 = vpop.permute.xlu0 %2180  ;;  %v3331_v15 = vpop.f32.mrf.mxu1 }
 0x17c   : > { %v2592_v31 = vadd.f32 %v2591_v49, %v2590_v8  ;;  %v2547_v46 = vmul.f32 %v2443_v44, %v2443_v44  ;;  %2778 = vst.msk [vmem:[%s4562_s30 + $0x4c] sm:$0xf] %vm2758_vm8, %v3194_v39  ;;  %v2441_v2 = vmul.f32 %v4641_v52, %v2249_v9  ;;  %v1330_v43 = vadd.f32 %v4716_v12, %v5038_v40  ;;  %v5043_v8 = vld [vmem:[#allocation19_spill] sm:$0xff]  ;;  %v5045_v40 = vld [vmem:[#allocation14_spill] sm:$0xff] }
 0x17d   : > { %v2446_v38 = vmul.f32 %v2377_v16, %v2254_v23  ;;  %v2252_v55 = vadd.f32 %v4545_v50, %v2213_v10  ;;  %v1800_v54 = vadd.f32 %v4710_v48, %v1338_v32  ;;  %v1351_v25 = vadd.f32 %v3327_v5, %v5039_v57  ;;  %v2397_v48 = vpop.permute.xlu1 %2396  ;;  %v1358_v22 = vpop.f32.mrf.mxu1 }
 0x17e   : > { %v2490_v3 = vsel %vm2456_vm9, %v2441_v2, 0.0  ;;  %v2545_v7 = vmul.f32 %v2441_v2, %v2441_v2  ;;  %v3192_v52 = vpack.c.bf16 %v2441_v2, %v2441_v2  ;;  %v1798_v11 = vadd.f32 %v4728_v33, %v1330_v43 }
 0x17f   : > { %v2595_v12 = vsel %vm2456_vm9, %v2546_v27, 0.0  ;;  %v2491_v16 = vadd.f32 %v2490_v3, %v2489_v37  ;;  %v3197_v29 = vpack.c.bf16 %v2446_v38, %v2446_v38  ;;  %v1343_v17 = vadd.f32 %v1342_v56, %v5040_v36  ;;  %v1749_v56 = vpop.f32.mrf.mxu0  ;;  %v5044_v37 = vld [vmem:[#allocation25_spill] sm:$0xff]  ;;  %v3332_v36 = vpop.f32.mrf.mxu1 }
 0x180   : > { %v2593_v5 = vsel %vm2456_vm9, %v2545_v7, 0.0  ;;  %2776 = vst.msk [vmem:[%s4562_s30 + $0x44] sm:$0xf] %vm2758_vm8, %v3192_v52  ;;  %v2444_v4 = vmul.f32 %v4712_v18, %v2252_v55  ;;  %v2216_v61 = vmul.f32 %v5041_v41, %v1800_v54  ;;  %v2214_v34 = vmul.f32 %v5042_v47, %v1798_v11  ;;  %v5046_v52 = vld [vmem:[#allocation26_spill] sm:$0xff]  ;;  %v5048_v47 = vld [vmem:[#allocation24_spill] sm:$0xff] }
 0x181   : > { %v2494_v51 = vsel %vm2456_vm9, %v2443_v44, 0.0  ;;  %v2493_v33 = vadd.f32 %v2492_v45, %v2491_v16  ;;  %v2594_v60 = vadd.f32 %v2593_v5, %v2592_v31  ;;  %2781 = vst.msk [vmem:[%s4562_s30 + $0x58] sm:$0xf] %vm2758_vm8, %v3197_v29  ;;  %v1803_v0 = vadd.f32 %v3363_v20, %v1351_v25  ;;  %v2186_v45 = vpop.permute.xlu0 %2185  ;;  %v3367_v10 = vpop.f32.mrf.mxu0 }
 0x182   : > { %v2597_v63 = vsel %vm2456_vm9, %v2547_v46, 0.0  ;;  %v2548_v14 = vmul.f32 %v2444_v4, %v2444_v4  ;;  %v3195_v58 = vpack.c.bf16 %v2444_v4, %v2444_v4  ;;  %v2255_v18 = vadd.f32 %v4545_v50, %v2216_v61  ;;  %v2402_v32 = vpop.permute.xlu1 %2401 }
 0x183   : > { %v2596_v59 = vadd.f32 %v2595_v12, %v2594_v60  ;;  %v2495_v21 = vadd.f32 %v2494_v51, %v2493_v33  ;;  %v2253_v6 = vadd.f32 %v4545_v50, %v2214_v34  ;;  %v2219_v44 = vmul.f32 %v5043_v8, %v1803_v0  ;;  %v5047_v12 = vld [vmem:[#allocation27_spill] sm:$0xff]  ;;  %v1762_v29 = vpop.f32.mrf.mxu0 }
 0x184   : > { %v2496_v24 = vsel %vm2456_vm9, %v2444_v4, 0.0  ;;  %2779 = vst.msk [vmem:[%s4562_s30 + $0x50] sm:$0xf] %vm2758_vm8, %v3195_v58  ;;  %v2447_v20 = vmul.f32 %v4730_v1, %v2255_v18  ;;  %v1801_v27 = vadd.f32 %v1746_v35, %v1343_v17  ;;  %v1354_v39 = vadd.f32 %v3328_v28, %v5044_v37  ;;  %v1361_v18 = vpop.f32.mrf.mxu1 }
 0x185   : > { %v2497_v9 = vadd.f32 %v2496_v24, %v2495_v21  ;;  %v2598_v49 = vadd.f32 %v2597_v63, %v2596_v59  ;;  %v2445_v23 = vmul.f32 %v4699_v42, %v2253_v6  ;;  %v2258_v19 = vadd.f32 %v4545_v50, %v2219_v44  ;;  %v2191_v4 = vpop.permute.xlu0 %2190  ;;  %v3368_v58 = vpop.f32.mrf.mxu0  ;;  %v5049_v59 = vld [vmem:[#allocation20_spill] sm:$0xff] }
 0x186   : > { %v2550_v31 = vmul.f32 %v2446_v38, %v2446_v38  ;;  %v2599_v46 = vsel %vm2456_vm9, %v2548_v14, 0.0  ;;  %v3198_v2 = vpack.c.bf16 %v2447_v20, %v2447_v20  ;;  %v2217_v1 = vmul.f32 %v5045_v40, %v1801_v27  ;;  %v5050_v44 = vld [vmem:[#allocation28_spill] sm:$0xff] }
 0x187   : > { %v2600_v35 = vadd.f32 %v2599_v46, %v2598_v49  ;;  %v2498_v28 = vsel %vm2456_vm9, %v2445_v23, 0.0  ;;  %v2549_v43 = vmul.f32 %v2445_v23, %v2445_v23  ;;  %v3196_v55 = vpack.c.bf16 %v2445_v23, %v2445_v23  ;;  %v5052_v49 = vld [vmem:[#allocation30_spill] sm:$0xff] }
 0x188   : > { %v2500_v54 = vsel %vm2456_vm9, %v2446_v38, 0.0  ;;  %2782 = vst.msk [vmem:[%s4562_s30 + $0x5c] sm:$0xf] %vm2758_vm8, %v3198_v2  ;;  %v2499_v42 = vadd.f32 %v2498_v28, %v2497_v9  ;;  %v4811_v57 = vmul.f32 %v2397_v48, %v2258_v19  ;;  %v2256_v25 = vadd.f32 %v4545_v50, %v2217_v1 }
 0x189   : > { %v2601_v3 = vsel %vm2456_vm9, %v2549_v43, 0.0  ;;  %2780 = vst.msk [vmem:[%s4562_s30 + $0x54] sm:$0xf] %vm2758_vm8, %v3196_v55  ;;  %v1804_v7 = vadd.f32 %v3364_v62, %v1354_v39  ;;  %v1346_v11 = vadd.f32 %v1345_v53, %v5046_v52  ;;  %v1367_v16 = vadd.f32 %v3331_v15, %v5047_v12  ;;  %v2407_v53 = vpop.permute.xlu1 %2406  ;;  %v2417_v19 = vpop.permute.xlu0 %2416  ;;  %v5053_v43 = vld [vmem:[#allocation22_spill] sm:$0xff] }
 0x18a   : > { %v2603_v38 = vsel %vm2456_vm9, %v2550_v31, 0.0  ;;  %v2551_v17 = vmul.f32 %v2447_v20, %v2447_v20  ;;  %v2501_v5 = vadd.f32 %v2500_v54, %v2499_v42  ;;  %v2602_v48 = vadd.f32 %v2601_v3, %v2600_v35 }
 0x18b   : > { %v3201_v41 = vpack.c.bf16 %v4811_v57, %v4811_v57  ;;  %v2448_v61 = vmul.f32 %v4761_v13, %v2256_v25  ;;  %v2220_v62 = vmul.f32 %v5048_v47, %v1804_v7  ;;  %v1802_v34 = vadd.f32 %v1749_v56, %v1346_v11 }
 0x18c   : > { %v2502_v51 = vsel %vm2456_vm9, %v2447_v20, 0.0  ;;  %v2604_v33 = vadd.f32 %v2603_v38, %v2602_v48  ;;  %v1807_v60 = vadd.f32 %v3367_v10, %v1367_v16  ;;  %v2605_v13 = vsel %vm2456_vm9, %v2551_v17, 0.0  ;;  %v5051_v20 = vld [vmem:[#allocation29_spill] sm:$0xff] }
 0x18d   : > { %2785 = vst.msk [vmem:[%s4562_s30 + $0x68] sm:$0xf] %vm2758_vm8, %v3201_v41  ;;  %v2503_v0 = vadd.f32 %v2502_v51, %v2501_v5  ;;  %v2552_v15 = vmul.f32 %v2448_v61, %v2448_v61  ;;  %v3199_v63 = vpack.c.bf16 %v2448_v61, %v2448_v61  ;;  %v2259_v14 = vadd.f32 %v4545_v50, %v2220_v62  ;;  %v2412_v35 = vpop.permute.xlu1 %2411 }
 0x18e   : > { %v2218_v21 = vmul.f32 %v5049_v59, %v1802_v34  ;;  %v2223_v56 = vmul.f32 %v2186_v45, %v1807_v60  ;;  %v2606_v6 = vadd.f32 %v2605_v13, %v2604_v33  ;;  %v1359_v24 = vadd.f32 %v1358_v22, %v5050_v44 }
 0x18f   : > { %2783 = vst.msk [vmem:[%s4562_s30 + $0x60] sm:$0xf] %vm2758_vm8, %v3199_v63  ;;  %v2451_v8 = vmul.f32 %v2402_v32, %v2259_v14  ;;  %v1370_v27 = vadd.f32 %v3332_v36, %v5051_v20  ;;  %v2504_v37 = vsel %vm2456_vm9, %v2448_v61, 0.0  ;;  %v1362_v23 = vadd.f32 %v1361_v18, %v5052_v49  ;;  %v1765_v32 = vpop.f32.mrf.mxu0 }
 0x190   : > { %v2257_v39 = vadd.f32 %v4545_v50, %v2218_v21  ;;  %v2262_v9 = vadd.f32 %v4545_v50, %v2223_v56  ;;  %v2505_v10 = vadd.f32 %v2504_v37, %v2503_v0  ;;  %v2607_v45 = vsel %vm2456_vm9, %v2552_v15, 0.0 }
 0x191   : > { %v3202_v31 = vpack.c.bf16 %v2451_v8, %v2451_v8  ;;  %v1805_v46 = vadd.f32 %v1762_v29, %v1359_v24  ;;  %v1808_v40 = vadd.f32 %v3368_v58, %v1370_v27  ;;  %v1806_v1 = vadd.f32 %v1765_v32, %v1362_v23  ;;  %v2422_v47 = vpop.permute.xlu1 %2421 }
 0x192   : > { %v2449_v22 = vmul.f32 %v4753_v26, %v2257_v39  ;;  %v2454_v2 = vmul.f32 %v2417_v19, %v2262_v9  ;;  %v2608_v28 = vadd.f32 %v2607_v45, %v2606_v6  ;;  %v2554_v54 = vmul.f32 %v4811_v57, %v4811_v57 }
 0x193   : > { %2786 = vst.msk [vmem:[%s4562_s30 + $0x6c] sm:$0xf] %vm2758_vm8, %v3202_v31  ;;  %v2221_v55 = vmul.f32 %v5053_v43, %v1805_v46  ;;  %v2555_v7 = vmul.f32 %v2451_v8, %v2451_v8  ;;  %v2508_v12 = vsel %vm2456_vm9, %v4811_v57, 0.0  ;;  %v2224_v29 = vmul.f32 %v2191_v4, %v1808_v40 }
 0x194   : > { %v2506_v42 = vsel %vm2456_vm9, %v2449_v22, 0.0  ;;  %v2553_v25 = vmul.f32 %v2449_v22, %v2449_v22  ;;  %v3200_v3 = vpack.c.bf16 %v2449_v22, %v2449_v22  ;;  %v3205_v52 = vpack.c.bf16 %v2454_v2, %v2454_v2 }
 0x195   : > { %v2507_v26 = vadd.f32 %v2506_v42, %v2505_v10  ;;  %v2260_v11 = vadd.f32 %v4545_v50, %v2221_v55  ;;  %v2222_v36 = vmul.f32 %v4779_v30, %v1806_v1  ;;  %v2611_v48 = vsel %vm2456_vm9, %v2554_v54, 0.0 }
 0x196   : > { %v2609_v16 = vsel %vm2456_vm9, %v2553_v25, 0.0  ;;  %2784 = vst.msk [vmem:[%s4562_s30 + $0x64] sm:$0xf] %vm2758_vm8, %v3200_v3  ;;  %2789 = vst.msk [vmem:[%s4562_s30 + $0x78] sm:$0xf] %vm2758_vm8, %v3205_v52  ;;  %v2510_v41 = vsel %vm2456_vm9, %v2451_v8, 0.0  ;;  %v2263_v61 = vadd.f32 %v4545_v50, %v2224_v29  ;;  %v2558_v63 = vmul.f32 %v2454_v2, %v2454_v2 }
 0x197   : > { %v2509_v38 = vadd.f32 %v2508_v12, %v2507_v26  ;;  %v2610_v17 = vadd.f32 %v2609_v16, %v2608_v28  ;;  %v2452_v5 = vmul.f32 %v2407_v53, %v2260_v11  ;;  %v2261_v57 = vadd.f32 %v4545_v50, %v2222_v36 }
 0x198   : > { %v2613_v62 = vsel %vm2456_vm9, %v2555_v7, 0.0  ;;  %v2455_v53 = vmul.f32 %v2422_v47, %v2263_v61  ;;  %v2516_v56 = vsel %vm2456_vm9, %v2454_v2, 0.0  ;;  %v2619_v27 = vsel %vm2456_vm9, %v2558_v63, 0.0 }
 0x199   : > { %v2612_v4 = vadd.f32 %v2611_v48, %v2610_v17  ;;  %v2511_v34 = vadd.f32 %v2510_v41, %v2509_v38  ;;  %v2556_v30 = vmul.f32 %v2452_v5, %v2452_v5  ;;  %v2512_v51 = vsel %vm2456_vm9, %v2452_v5, 0.0 }
 0x19a   : > { %v3203_v33 = vpack.c.bf16 %v2452_v5, %v2452_v5  ;;  %v2453_v60 = vmul.f32 %v2412_v35, %v2261_v57  ;;  %v3206_v50 = vpack.c.bf16 %v2455_v53, %v2455_v53  ;;  %v2559_v6 = vmul.f32 %v2455_v53, %v2455_v53 }
 0x19b   : > { %v2513_v0 = vadd.f32 %v2512_v51, %v2511_v34  ;;  %v2614_v15 = vadd.f32 %v2613_v62, %v2612_v4  ;;  %v2615_v14 = vsel %vm2456_vm9, %v2556_v30, 0.0  ;;  %v2518_v24 = vsel %vm2456_vm9, %v2455_v53, 0.0 }
 0x19c   : > { %2787 = vst.msk [vmem:[%s4562_s30 + $0x70] sm:$0xf] %vm2758_vm8, %v3203_v33  ;;  %v2514_v58 = vsel %vm2456_vm9, %v2453_v60, 0.0  ;;  %v2557_v59 = vmul.f32 %v2453_v60, %v2453_v60  ;;  %v3204_v21 = vpack.c.bf16 %v2453_v60, %v2453_v60  ;;  %2790 = vst.msk [vmem:[%s4562_s30 + $0x7c] sm:$0xf] %vm2758_vm8, %v3206_v50  ;;  %v2621_v9 = vsel %vm2456_vm9, %v2559_v6, 0.0 }
 0x19d   : > { %v2616_v18 = vadd.f32 %v2615_v14, %v2614_v15  ;;  %v2515_v13 = vadd.f32 %v2514_v58, %v2513_v0 }
 0x19e   : > { %v2617_v44 = vsel %vm2456_vm9, %v2557_v59, 0.0  ;;  %2788 = vst.msk [vmem:[%s4562_s30 + $0x74] sm:$0xf] %vm2758_vm8, %v3204_v21  ;;  %s3647_s30 = smov [#allocation2]  }
 0x19f   : > { %v2517_v8 = vadd.f32 %v2516_v56, %v2515_v13  ;;  %v2618_v20 = vadd.f32 %v2617_v44, %v2616_v18  ;;  %s3542_s17 = sshll.u32 %s3647_s30, 4  ;;  %s3543_s17 = int_to_ptr.vmem [resolvable:$false] %s3542_s17 }
 0x1a0   : > { %s3544_s18 = scalar_lea.vmem %s3543_s17, 32  ;;  %p3545_p1 = scmp.lt.s32.totalorder %s4887_s13, %s3543_s17 }
 0x1a1   : > { %v2519_v37 = vadd.f32 %v2518_v24, %v2517_v8  ;;  %v2620_v39 = vadd.f32 %v2619_v27, %v2618_v20  ;;  %p3546_p2 = scmp.lt.s32.totalorder %s3544_s18, %s3538_s15 }
 0x1a3   : > { %v2520_v49 = vrot.slane %v2519_v37, 4  ;;  %v2622_v23 = vadd.f32 %v2621_v9, %v2620_v39  ;;  %p3547_p3 = por %p3546_p2, %p3545_p1 }
 0x1a5   : > { %v2521_v19 = vadd.f32 %v2520_v49, %v2519_v37  ;;  %v2623_v10 = vrot.slane %v2622_v23, 4  ;;  %p3548_p5 = pnand %p3547_p3, %p3541_p0 }
 0x1a7   : > { %v2522_v45 = vrot.slane %v2521_v19, 2  ;;  %v2624_v31 = vadd.f32 %v2623_v10, %v2622_v23 }
 0x1a9   : > { %v2523_v46 = vadd.f32 %v2522_v45, %v2521_v19  ;;  %v2625_v32 = vrot.slane %v2624_v31, 2 }
 0x1ab   : > { %v2524_v22 = vrot.slane %v2523_v46, 1  ;;  %v2626_v2 = vadd.f32 %v2625_v32, %v2624_v31 }
 0x1ad   : > { %v2525_v40 = vadd.f32 %v2524_v22, %v2523_v46  ;;  %v2627_v1 = vrot.slane %v2626_v2, 1 }
 0x1af   : > { %2527 = vst.msk [vmem:[%s318_s12] sm:$0x1] %vm2526_vm10, %v2525_v40 }
 0x1b0   : > { %3551 = shalt.err (!%p3548_p5)
}
 0x1b1   : > { %s3552_s11 = scalar_lea.hbm %s4885_s19, 16  ;;  %s3556_s20 = scalar_lea.hbm %s4969_s5, 32 }
 0x1b2   : > { %p3553_p6 = scmp.ne.s32.totalorder %s4885_s19, %s3552_s11  ;;  %p3557_p10 = scmp.lt.s32.totalorder %s4885_s19, %s4969_s5 }
 0x1b3   : > { %p3558_p11 = scmp.lt.s32.totalorder %s3556_s20, %s3552_s11 }
 0x1b4   : > { %p3554_p7 = pnand %p3553_p6, %p3724_p4 }
 0x1b5   : > { %p3559_p12 = por %p3558_p11, %p3557_p10 }
 0x1b6   : > { %p3555_p9 = pneg %p3554_p7 }
 0x1b8   : > { %p3560_p13 = pnand %p3559_p12, %p3555_p9 }
 0x1ba   : > { %3563 = shalt.err (!%p3560_p13)
}
 0x1bb   : > { %3378 = dma.vmem_to_hbm [thread:$0]  (%p3724_p4), %s4887_s13, 16, %s4885_s19, %s2802_s28   ;;  %v2628_v35 = vadd.f32 %v2627_v1, %v2626_v2 }
 0x1bc   : > { %s5054_s15 = scalar_lea.vmem [#allocation4], %s4875_s8  ;;  %s2806_s14 = scalar_lea.sflag [#allocation5], %s4875_s8 }
 0x1bd   : > { %2629 = vst.msk [vmem:[%s5054_s15] sm:$0x1] %vm2526_vm10, %v2628_v35  ;;  %s3564_s17 = scalar_lea.vmem %s4895_s16, 16  ;;  %s3648_s18 = smov [#allocation4]  }
 0x1be   : > { %p3565_p0 = scmp.ne.s32.totalorder %s4895_s16, %s3564_s17  ;;  %s3568_s11 = sshll.u32 %s3648_s18, 4  ;;  %s3569_s11 = int_to_ptr.vmem [resolvable:$false] %s3568_s11 }
 0x1bf   : > { %s3570_s12 = scalar_lea.vmem %s3569_s11, 32  ;;  %p3571_p3 = scmp.lt.s32.totalorder %s4895_s16, %s3569_s11 }
 0x1c0   : > { %p3566_p1 = pnand %p3565_p0, %p3724_p4  ;;  %p3572_p5 = scmp.lt.s32.totalorder %s3570_s12, %s3564_s17 }
 0x1c2   : > { %p3567_p2 = pneg %p3566_p1  ;;  %p3573_p6 = por %p3572_p5, %p3571_p3 }
 0x1c4   : > { %p3574_p7 = pnand %p3573_p6, %p3567_p2 }
 0x1c6   : > { %3577 = shalt.err (!%p3574_p7)
}
 0x1c7   : > { %s3578_s13 = scalar_lea.hbm %s4893_s27, 16  ;;  %s3582_s28 = scalar_lea.hbm %s4970_s6, 32 }
 0x1c8   : > { %p3579_p9 = scmp.ne.s32.totalorder %s4893_s27, %s3578_s13  ;;  %p3583_p12 = scmp.lt.s32.totalorder %s4893_s27, %s4970_s6 }
 0x1c9   : > { %p3584_p13 = scmp.lt.s32.totalorder %s3582_s28, %s3578_s13 }
 0x1ca   : > { %p3580_p10 = pnand %p3579_p9, %p3724_p4 }
 0x1cb   : > { %p3585_p0 = por %p3584_p13, %p3583_p12 }
 0x1cc   : > { %p3581_p11 = pneg %p3580_p10 }
 0x1ce   : > { %p3586_p1 = pnand %p3585_p0, %p3581_p11 }
 0x1d0   : > { %3589 = shalt.err (!%p3586_p1)
}
 0x1d1   : > { %3379 = dma.vmem_to_hbm [thread:$0]  (%p3724_p4), %s4895_s16, 16, %s4893_s27, %s2806_s14  }
 0x1d2 PF: > { %p3389_p2 = scmp.ge.s32.totalorder %s3644_s26, 2  ;;  %s2862_s30 = sand.u32 1, %s3624_s21  }
 0x1d3   : > { %s2863_s15 = scalar_lea.sflag [#allocation3], %s2862_s30 }
 0x1d4   : > { %p3383_p3 = pnand %p3389_p2, %p3731_p8 }
 0x1d6   : > { %p3384_p5 = pneg %p3383_p3 }
 0x1d8   : > { %3615 = dma.done.wait (%p3384_p5), %s2863_s15, 16  }
 0x1d9   : > { %3617 = vsyncadd (%p3384_p5), %s2863_s15, 4294967280  ;;  %s2871_s17 = scalar_lea.sflag [#allocation5], %s2862_s30 }
 0x1da   : > { %3619 = dma.done.wait (%p3384_p5), %s2871_s17, 16  }
 0x1db   : > { %3621 = vsyncadd (%p3384_p5), %s2871_s17, 4294967280  ;;  %s23_s26 = sadd.s32 1, %s3644_s26   ;;  %s5055_s21 = smov %s3628_s22 }
 0x1dc   : > { %p20_p6 = scmp.ge.s32.totalorder %s23_s26, 4   ;;  %s5056_s22 = smov %s3632_s23 }
 0x1dd   : > { %s5057_s23 = smov %s3737_s10  ;;  %s5058_s24 = smov %s3640_s25 }
 0x1de   : > { %s5059_s25 = smov %s5061_s29  ;;  %22 = sbr.rel (!%p20_p6) target bundleno = 6 (0x6), region = 105 }
 0x1e3   :  { %2875 = vsyncpa [#allocation3], 1 }
 0x1e4   :  { %2877 = vsyncpa [#allocation3 + $0x1], 1 }
 0x1e5   :  { %2878 = vsyncpa [#allocation5], 1 }
 0x1e6   :  { %2880 = vsyncpa [#allocation5 + $0x1], 1 }

</bundles_post_ra>
